<compile_context>
chip_gen: v5e
topology: v5e:2x2
jax: 0.10.0
libtpu: 0.0.40
codegen_flags: <defaults>
</compile_context>

<pallas_src>
import jax
import jax.numpy as jnp
from jax import lax
from jax.experimental import pallas as pl
from jax.experimental.pallas import tpu as pltpu


_VMEM = pl.BlockSpec(memory_space=pltpu.MemorySpace.VMEM)
_VMEM_LIMIT = 32 * 1024 * 1024


# ----------------------------- Pallas kernels ------------------------------

def _conv0_stats_kernel(xs_ref, w0_ref, w1_ref, y_ref, stats_ref):
    """Layer-0 conv (k=4,s=2,p=1) for one image + BN partial-stat accumulation.

    xs_ref:    (1, Hs, Ws*4C)   bf16  space-to-depth'd zero-padded input image
    w0/w1_ref: (Ws*4C, Wo*Cout) bf16  folded conv weights for row-tap dh=0/1
    y_ref:     (1, Ho, Wo*Cout) bf16  conv output (pre-BN) for this image
    stats_ref: (2, Wo*Cout)     f32   resident accumulator [sum; sum-of-squares]
    """
    n = pl.program_id(0)

    @pl.when(n == 0)
    def _():
        stats_ref[...] = jnp.zeros_like(stats_ref)

    xv = xs_ref[0]                                              # (Hs, Ws*4C) bf16
    y0 = jnp.dot(xv, w0_ref[...], preferred_element_type=jnp.float32)
    y1 = jnp.dot(xv, w1_ref[...], preferred_element_type=jnp.float32)
    ho = y_ref.shape[1]                                         # Hs = Ho + 1
    acc = y0[0:ho, :] + y1[1:ho + 1, :]                         # (Ho, Wo*Cout) f32
    y_ref[0] = acc.astype(y_ref.dtype)

    s = jnp.sum(acc, axis=0, keepdims=True)
    ss = jnp.sum(acc * acc, axis=0, keepdims=True)
    stats_ref[...] += jnp.concatenate([s, ss], axis=0)


def _bn_act_conv_stats_kernel(xs_ref, sc_ref, sh_ref, w0_ref, w1_ref,
                              y_ref, stats_ref):
    """Fused block for layers 1..3.

    Applies the previous layer's BatchNorm affine + LeakyReLU(0.2) to the
    space-to-depth'd *pre-BN* activation (the zero-padding positions have
    scale=shift=0 folded into sc/sh, so they stay exactly zero), then performs
    this layer's conv (k=4,s=2,p=1) and accumulates BN partial statistics.

    xs_ref:    (1, Hs, Ws*4C)   bf16  s2d of zero-padded pre-BN previous output
    sc/sh_ref: (Hs, Ws*4C)      f32   masked per-position BN scale / shift
    w0/w1_ref: (Ws*4C, Wo*Cout) bf16  folded conv weights for row-tap dh=0/1
    y_ref:     (1, Ho, Wo*Cout) bf16  conv output (pre-BN) for this image
    stats_ref: (2, Wo*Cout)     f32   resident accumulator [sum; sum-of-squares]
    """
    n = pl.program_id(0)

    @pl.when(n == 0)
    def _():
        stats_ref[...] = jnp.zeros_like(stats_ref)

    z = xs_ref[0].astype(jnp.float32) * sc_ref[...] + sh_ref[...]
    z = jnp.where(z >= 0.0, z, 0.2 * z).astype(jnp.bfloat16)    # (Hs, Ws*4C)
    y0 = jnp.dot(z, w0_ref[...], preferred_element_type=jnp.float32)
    y1 = jnp.dot(z, w1_ref[...], preferred_element_type=jnp.float32)
    ho = y_ref.shape[1]
    acc = y0[0:ho, :] + y1[1:ho + 1, :]
    y_ref[0] = acc.astype(y_ref.dtype)

    s = jnp.sum(acc, axis=0, keepdims=True)
    ss = jnp.sum(acc * acc, axis=0, keepdims=True)
    stats_ref[...] += jnp.concatenate([s, ss], axis=0)


def _head_kernel(y_ref, sc_ref, sh_ref, w4_ref, b4_ref, wfc_ref, bfc_ref,
                 o_ref):
    """Fused head: BN3 affine + LeakyReLU + Conv(4x4,s=1,p=0) + Linear + Sigmoid.

    y_ref:  (N, 4, 4*Cin)  bf16  pre-BN output of block 3 (lane = kw*Cin + c)
    sc/sh:  (1, 4*Cin)     f32   per-lane BN scale / shift
    w4_ref: (4, 4*Cin, F)  bf16  final conv weight, row-tap kh major
    b4_ref: (1, F) f32; wfc_ref: (1, F) f32; bfc_ref: (1, 1) f32
    o_ref:  (N, 1) f32
    """
    nb = y_ref.shape[0]
    feat = b4_ref.shape[-1]
    acc = jnp.zeros((nb, feat), jnp.float32)
    for kh in range(y_ref.shape[1]):                            # static (4), unrolled
        z = y_ref[:, kh, :] * sc_ref[...] + sh_ref[...]         # (N, 4*Cin) f32
        z = jnp.where(z >= 0.0, z, 0.2 * z).astype(jnp.bfloat16)
        acc = acc + jnp.dot(z, w4_ref[kh], preferred_element_type=jnp.float32)
    y = acc + b4_ref[...]                                       # (N, F)
    logit = jnp.sum(y * wfc_ref[...], axis=1, keepdims=True) + bfc_ref[...]
    o_ref[...] = jax.nn.sigmoid(logit)


# ------------------------------- JAX glue ----------------------------------

def _space_to_depth_pad(x_nhwc):
    """(N,H,W,C) -> (N, H/2+1, (W/2+1)*4C).  pad=1, factor-2 space-to-depth.

    Minor-dim order per s2d column j is (row-parity a, col-parity b, channel c):
    xs[n, i, j*4C + (2a+b)*C + c] == xpad[n, 2i+a, 2j+b, c].
    """
    N, H, W, C = x_nhwc.shape
    xp = jnp.pad(x_nhwc, ((0, 0), (1, 1), (1, 1), (0, 0)))
    Hs, Ws = (H + 2) // 2, (W + 2) // 2
    xs = xp.reshape(N, Hs, 2, Ws, 2, C).transpose(0, 1, 3, 2, 4, 5)
    return xs.reshape(N, Hs, Ws * 4 * C), Hs, Ws


def _fold_conv_weight(w, wo):
    """(Cout, Cin, 4, 4) conv weight -> two (Ws*4Cin, Wo*Cout) bf16 matrices.

    Folds the kernel-column taps (dw in {0,1}) and the output-column selection
    into a banded matrix, so the whole conv is 2 plain matmuls on the s2d input.
    T[dh, dw, (2a+b)*C + c, co] = w[co, c, 2dh+a, 2dw+b].
    """
    cout, cin, _, _ = w.shape
    ws = wo + 1
    t = (w.reshape(cout, cin, 2, 2, 2, 2)
          .transpose(2, 4, 3, 5, 1, 0)
          .reshape(2, 2, 4 * cin, cout))
    j = jnp.arange(ws)[:, None]
    ow = jnp.arange(wo)[None, :]
    folded = []
    for dh in range(2):
        wf = jnp.zeros((ws, 4 * cin, wo, cout), jnp.float32)
        for dw in range(2):
            band = (j == ow + dw).astype(jnp.float32)            # (Ws, Wo)
            wf = wf + jnp.einsum('jw,qo->jqwo', band, t[dh, dw])
        folded.append(wf.reshape(ws * 4 * cin, wo * cout).astype(jnp.bfloat16))
    return folded[0], folded[1]


def _bn_scale_shift(stats, gamma, beta, n, ho, wo, eps=1e-5):
    """Resident stats (2, Wo*Cout) -> per-channel BN (scale, shift), f32."""
    cout = gamma.shape[0]
    m = float(n * ho * wo)
    s = stats.reshape(2, wo, cout).sum(axis=1)                   # (2, Cout)
    mean = s[0] / m
    var = jnp.maximum(s[1] / m - mean * mean, 0.0)               # biased batch var
    scale = gamma * lax.rsqrt(var + eps)
    shift = beta - mean * scale
    return scale, shift


def _s2d_affine(scale, shift, hs, ws):
    """Per-channel (scale, shift) -> (Hs, Ws*4C) tables in the s2d lane layout,
    with zero-padding positions forced to scale=shift=0 (so affine + LeakyReLU
    leaves them exactly zero inside the kernel)."""
    c = scale.shape[0]
    i = jnp.arange(hs)[:, None]
    a = jnp.arange(2)[None, :]
    row_ok = ~((i == 0) & (a == 0)) & ~((i == hs - 1) & (a == 1))   # (Hs, 2)
    j = jnp.arange(ws)[:, None]
    b = jnp.arange(2)[None, :]
    col_ok = ~((j == 0) & (b == 0)) & ~((j == ws - 1) & (b == 1))   # (Ws, 2)
    mask = row_ok[:, None, :, None, None] & col_ok[None, :, None, :, None]
    sc = jnp.where(mask, scale[None, None, None, None, :], 0.0)
    sh = jnp.where(mask, shift[None, None, None, None, :], 0.0)
    return (sc.reshape(hs, ws * 4 * c).astype(jnp.float32),
            sh.reshape(hs, ws * 4 * c).astype(jnp.float32))


def _conv_layer0(x_nhwc, w):
    """Layer 0: Conv(k4,s2,p1) of the raw input.  Returns pre-BN output
    (N, Ho, Wo*Cout) bf16 and resident BN partial stats."""
    N, H, W, C = x_nhwc.shape
    cout = w.shape[0]
    Ho, Wo = H // 2, W // 2
    xs, Hs, Ws = _space_to_depth_pad(x_nhwc.astype(jnp.bfloat16))
    w0, w1 = _fold_conv_weight(w, Wo)
    w4c = Ws * 4 * C
    woc = Wo * cout

    y, stats = pl.pallas_call(
        _conv0_stats_kernel,
        grid=(N,),
        in_specs=[
            pl.BlockSpec((1, Hs, w4c), lambda n: (n, 0, 0)),
            pl.BlockSpec((w4c, woc), lambda n: (0, 0)),
            pl.BlockSpec((w4c, woc), lambda n: (0, 0)),
        ],
        out_specs=(
            pl.BlockSpec((1, Ho, woc), lambda n: (n, 0, 0)),
            pl.BlockSpec((2, woc), lambda n: (0, 0)),      # resident accumulator
        ),
        out_shape=(
            jax.ShapeDtypeStruct((N, Ho, woc), jnp.bfloat16),
            jax.ShapeDtypeStruct((2, woc), jnp.float32),
        ),
        compiler_params=pltpu.CompilerParams(
            dimension_semantics=("arbitrary",),            # stats reduce over N
            vmem_limit_bytes=_VMEM_LIMIT,
        ),
    )(xs, w0, w1)
    return y, stats, Ho, Wo


def _conv_layer_fused(y_prev, scale, shift, w):
    """Layers 1..3: fused (previous-layer BN affine + LeakyReLU) -> Conv(k4,s2,p1)."""
    cout, cin = w.shape[0], w.shape[1]
    N, H = y_prev.shape[0], y_prev.shape[1]
    W = y_prev.shape[2] // cin
    Ho, Wo = H // 2, W // 2
    # s2d of the zero-padded *pre-BN* previous activation (bf16); the padding
    # positions are neutralized by the masked scale/shift tables in-kernel.
    xs, Hs, Ws = _space_to_depth_pad(y_prev.reshape(N, H, W, cin))
    sc2d, sh2d = _s2d_affine(scale, shift, Hs, Ws)
    w0, w1 = _fold_conv_weight(w, Wo)
    w4c = Ws * 4 * cin
    woc = Wo * cout

    y, stats = pl.pallas_call(
        _bn_act_conv_stats_kernel,
        grid=(N,),
        in_specs=[
            pl.BlockSpec((1, Hs, w4c), lambda n: (n, 0, 0)),
            pl.BlockSpec((Hs, w4c), lambda n: (0, 0)),
            pl.BlockSpec((Hs, w4c), lambda n: (0, 0)),
            pl.BlockSpec((w4c, woc), lambda n: (0, 0)),
            pl.BlockSpec((w4c, woc), lambda n: (0, 0)),
        ],
        out_specs=(
            pl.BlockSpec((1, Ho, woc), lambda n: (n, 0, 0)),
            pl.BlockSpec((2, woc), lambda n: (0, 0)),
        ),
        out_shape=(
            jax.ShapeDtypeStruct((N, Ho, woc), jnp.bfloat16),
            jax.ShapeDtypeStruct((2, woc), jnp.float32),
        ),
        compiler_params=pltpu.CompilerParams(
            dimension_semantics=("arbitrary",),
            vmem_limit_bytes=_VMEM_LIMIT,
        ),
    )(xs, sc2d, sh2d, w0, w1)
    return y, stats, Ho, Wo


def _head(y3, scale3, shift3, w4, b4, fc_w, fc_b):
    """Fused BN3 apply + LeakyReLU + Conv2d(k=4,s=1,p=0) + Flatten + Linear + Sigmoid."""
    N = y3.shape[0]
    feat, cin = w4.shape[0], w4.shape[1]
    wo3 = y3.shape[2] // cin
    # (kh, kw*Cin, F), matching the (N, kh, kw*Cin) layout of y3.
    w4m = w4.transpose(2, 3, 1, 0).reshape(4, 4 * cin, feat).astype(jnp.bfloat16)
    sc = jnp.tile(scale3, wo3).reshape(1, wo3 * cin).astype(jnp.float32)
    sh = jnp.tile(shift3, wo3).reshape(1, wo3 * cin).astype(jnp.float32)
    return pl.pallas_call(
        _head_kernel,
        out_shape=jax.ShapeDtypeStruct((N, 1), jnp.float32),
        in_specs=[_VMEM] * 7,
        out_specs=_VMEM,
        compiler_params=pltpu.CompilerParams(vmem_limit_bytes=_VMEM_LIMIT),
    )(y3, sc, sh, w4m,
      b4.reshape(1, feat).astype(jnp.float32),
      fc_w.reshape(1, feat).astype(jnp.float32),
      fc_b.reshape(1, 1).astype(jnp.float32))


# --------------------------- parameter creation -----------------------------

def init_discriminator_params(key, input_channels, features):
    """Deterministic params mimicking PyTorch default init bounds."""
    chans = [input_channels, features // 16, features // 8,
             features // 4, features // 2, features]
    params = {}
    k = 4
    for i in range(5):
        cin, cout = chans[i], chans[i + 1]
        key, kw_, kb_ = jax.random.split(key, 3)
        bound = 1.0 / jnp.sqrt(cin * k * k)
        params[f"conv{i}_w"] = jax.random.uniform(
            kw_, (cout, cin, k, k), jnp.float32, -bound, bound)
        # Biases for conv0..3 are kept only for parameter parity with PyTorch;
        # they are exactly cancelled by train-mode BatchNorm mean subtraction.
        params[f"conv{i}_b"] = jax.random.uniform(
            kb_, (cout,), jnp.float32, -bound, bound)
        if i < 4:  # conv blocks 0..3 have BatchNorm (default init gamma=1, beta=0)
            params[f"bn{i}_gamma"] = jnp.ones((cout,), jnp.float32)
            params[f"bn{i}_beta"] = jnp.zeros((cout,), jnp.float32)
    key, kw_, kb_ = jax.random.split(key, 3)
    bound = 1.0 / jnp.sqrt(features)
    params["fc_w"] = jax.random.uniform(kw_, (1, features), jnp.float32, -bound, bound)
    params["fc_b"] = jax.random.uniform(kb_, (1,), jnp.float32, -bound, bound)
    return params


# ------------------------------ forward pass --------------------------------

def discriminator_forward(params, x):
    """x: (N, C, 64, 64) float32 NCHW (PyTorch convention) -> (N, 1) probabilities."""
    N, C, H, W = x.shape
    assert H == 64 and W == 64, "DCGAN discriminator expects 64x64 inputs"
    # Single layout change at the boundary: NCHW -> NHWC.
    h = x.transpose(0, 2, 3, 1)

    # Block 0: conv + BN stats.
    y, stats, Ho, Wo = _conv_layer0(h, params["conv0_w"])
    scale, shift = _bn_scale_shift(stats, params["bn0_gamma"], params["bn0_beta"],
                                   N, Ho, Wo)
    # Blocks 1..3: previous block's BN apply + LeakyReLU fused into this conv.
    for i in range(1, 4):
        y, stats, Ho, Wo = _conv_layer_fused(y, scale, shift, params[f"conv{i}_w"])
        scale, shift = _bn_scale_shift(stats, params[f"bn{i}_gamma"],
                                       params[f"bn{i}_beta"], N, Ho, Wo)
    # Head: BN3 apply + LeakyReLU + final conv + Linear + Sigmoid, all fused.
    return _head(y, scale, shift, params["conv4_w"], params["conv4_b"],
                 params["fc_w"], params["fc_b"])


# ---------------------------------- main -------------------------------------

if __name__ == "__main__":
    key = jax.random.PRNGKey(0)
    k_params, k_x = jax.random.split(key)

    input_channels = 3
    features = 64          # -> layer widths 4, 8, 16, 32, 64
    batch = 2
    # Spatial size must be 64 so the final k=4,s=1,p=0 conv yields 1x1.
    x = jax.random.normal(k_x, (batch, input_channels, 64, 64), jnp.float32)

    params = init_discriminator_params(k_params, input_channels, features)

    fwd = jax.jit(discriminator_forward)
    out = jax.block_until_ready(fwd(params, x))

    assert out.shape == (batch, 1)
    assert bool(jnp.all(jnp.isfinite(out)))
    assert bool(jnp.all((out > 0.0) & (out < 1.0)))
    print("KERNEL_OK")
</pallas_src>

<mosaic_0001>
module attributes {stable_mosaic.version = 11 : i64} {
  func.func @_conv0_stats_kernel(%arg0: i32, %arg1: memref<1x33x396xbf16, #tpu.memory_space<vmem>>, %arg2: memref<396x128xbf16, #tpu.memory_space<vmem>>, %arg3: memref<396x128xbf16, #tpu.memory_space<vmem>>, %arg4: memref<1x32x128xbf16, #tpu.memory_space<vmem>>, %arg5: memref<2x128xf32, #tpu.memory_space<vmem>>) attributes {dimension_semantics = [#tpu.dimension_semantics<arbitrary>], iteration_bounds = array<i64: 2>, scalar_prefetch = 0 : i64, scratch_operands = 0 : i64, tpu.core_type = #tpu.core_type<tc>, window_params = [{transform_indices = @transform_0, window_bounds = array<i64: 1, 33, 396>}, {pipeline_mode = #tpu.pipeline_mode<synchronous>, transform_indices = @transform_1, window_bounds = array<i64: 396, 128>}, {pipeline_mode = #tpu.pipeline_mode<synchronous>, transform_indices = @transform_2, window_bounds = array<i64: 396, 128>}, {transform_indices = @transform_3, window_bounds = array<i64: 1, 32, 128>}, {pipeline_mode = #tpu.pipeline_mode<synchronous>, transform_indices = @transform_4, window_bounds = array<i64: 2, 128>}]} {
    %c0_i32 = arith.constant 0 : i32
    %0 = arith.cmpi eq, %arg0, %c0_i32 : i32
    %1 = arith.extui %0 : i1 to i32
    %c0_i32_0 = arith.constant 0 : i32
    %2 = arith.cmpi ne, %1, %c0_i32_0 : i32
    scf.if %2 {
      %cst_17 = arith.constant 0.000000e+00 : f32
      %25 = vector.broadcast %cst_17 : f32 to vector<2x128xf32>
      %c0_18 = arith.constant 0 : index
      %c0_19 = arith.constant 0 : index
      %26 = vector.load %arg5[%c0_18, %c0_19] : memref<2x128xf32, #tpu.memory_space<vmem>>, vector<2x128xf32>
      tpu.vector_store %arg5[%c0_18, %c0_19], %25 {strides = array<i32>} : memref<2x128xf32, #tpu.memory_space<vmem>>, vector<2x128xf32>,
    } else {
    }
    %c0 = arith.constant 0 : index
    %c0_1 = arith.constant 0 : index
    %c0_2 = arith.constant 0 : index
    %3 = vector.load %arg1[%c0, %c0_1, %c0_2] : memref<1x33x396xbf16, #tpu.memory_space<vmem>>, vector<1x33x396xbf16>
    %4 = vector.shape_cast %3 : vector<1x33x396xbf16> to vector<33x396xbf16>
    %c0_3 = arith.constant 0 : index
    %c0_4 = arith.constant 0 : index
    %5 = vector.load %arg2[%c0_3, %c0_4] : memref<396x128xbf16, #tpu.memory_space<vmem>>, vector<396x128xbf16>
    %cst = arith.constant dense<0.000000e+00> : vector<33x128xf32>
    %6 = tpu.matmul %4, %5, %cst {dimension_numbers = #tpu.dot_dimension_numbers<[1], [0], [0], [1], [0, 0, 1, 1], [], []>} : vector<33x396xbf16>, vector<396x128xbf16>, vector<33x128xf32> -> vector<33x128xf32>
    %c0_5 = arith.constant 0 : index
    %c0_6 = arith.constant 0 : index
    %7 = vector.load %arg3[%c0_5, %c0_6] : memref<396x128xbf16, #tpu.memory_space<vmem>>, vector<396x128xbf16>
    %cst_7 = arith.constant dense<0.000000e+00> : vector<33x128xf32>
    %8 = tpu.matmul %4, %7, %cst_7 {dimension_numbers = #tpu.dot_dimension_numbers<[1], [0], [0], [1], [0, 0, 1, 1], [], []>} : vector<33x396xbf16>, vector<396x128xbf16>, vector<33x128xf32> -> vector<33x128xf32>
    %9 = vector.extract_strided_slice %6 {offsets = [0, 0], sizes = [32, 128], strides = [1, 1]} : vector<33x128xf32> to vector<32x128xf32>
    %10 = vector.extract_strided_slice %8 {offsets = [1, 0], sizes = [32, 128], strides = [1, 1]} : vector<33x128xf32> to vector<32x128xf32>
    %11 = arith.addf %9, %10 : vector<32x128xf32>
    %12 = arith.truncf %11 : vector<32x128xf32> to vector<32x128xbf16>
    %c0_8 = arith.constant 0 : index
    %c0_9 = arith.constant 0 : index
    %c0_10 = arith.constant 0 : index
    %13 = vector.load %arg4[%c0_8, %c0_9, %c0_10] : memref<1x32x128xbf16, #tpu.memory_space<vmem>>, vector<1x32x128xbf16>
    %14 = vector.shape_cast %13 : vector<1x32x128xbf16> to vector<32x128xbf16>
    %15 = vector.shape_cast %12 : vector<32x128xbf16> to vector<1x32x128xbf16>
    tpu.vector_store %arg4[%c0_8, %c0_9, %c0_10], %15 {strides = array<i32>} : memref<1x32x128xbf16, #tpu.memory_space<vmem>>, vector<1x32x128xbf16>,
    %cst_11 = arith.constant dense<0.000000e+00> : vector<128xf32>
    %16 = vector.multi_reduction <add>, %11, %cst_11 [0] : vector<32x128xf32> to vector<128xf32>
    %17 = vector.shape_cast %16 : vector<128xf32> to vector<1x128xf32>
    %18 = arith.mulf %11, %11 : vector<32x128xf32>
    %cst_12 = arith.constant dense<0.000000e+00> : vector<128xf32>
    %19 = vector.multi_reduction <add>, %18, %cst_12 [0] : vector<32x128xf32> to vector<128xf32>
    %20 = vector.shape_cast %19 : vector<128xf32> to vector<1x128xf32>
    %c0_13 = arith.constant 0 : index
    %c0_14 = arith.constant 0 : index
    %21 = vector.load %arg5[%c0_13, %c0_14] : memref<2x128xf32, #tpu.memory_space<vmem>>, vector<2x128xf32>
    %22 = tpu.concatenate %17, %20 in 0 : vector<1x128xf32>, vector<1x128xf32> -> vector<2x128xf32>
    %23 = arith.addf %21, %22 : vector<2x128xf32>
    %c0_15 = arith.constant 0 : index
    %c0_16 = arith.constant 0 : index
    %24 = vector.load %arg5[%c0_15, %c0_16] : memref<2x128xf32, #tpu.memory_space<vmem>>, vector<2x128xf32>
    tpu.vector_store %arg5[%c0_15, %c0_16], %23 {strides = array<i32>} : memref<2x128xf32, #tpu.memory_space<vmem>>, vector<2x128xf32>,
    return
  }
  func.func @transform_0(%arg0: i32) -> (i32, i32, i32) {
    %c0_i32 = arith.constant 0 : i32
    %c0_i32_0 = arith.constant 0 : i32
    %c0_i32_1 = arith.constant 0 : i32
    return %arg0, %c0_i32, %c0_i32_0 : i32, i32, i32
  }
  func.func @transform_1(%arg0: i32) -> (i32, i32) {
    %c0_i32 = arith.constant 0 : i32
    %c0_i32_0 = arith.constant 0 : i32
    %c0_i32_1 = arith.constant 0 : i32
    return %c0_i32, %c0_i32_0 : i32, i32
  }
  func.func @transform_2(%arg0: i32) -> (i32, i32) {
    %c0_i32 = arith.constant 0 : i32
    %c0_i32_0 = arith.constant 0 : i32
    %c0_i32_1 = arith.constant 0 : i32
    return %c0_i32, %c0_i32_0 : i32, i32
  }
  func.func @transform_3(%arg0: i32) -> (i32, i32, i32) {
    %c0_i32 = arith.constant 0 : i32
    %c0_i32_0 = arith.constant 0 : i32
    %c0_i32_1 = arith.constant 0 : i32
    return %arg0, %c0_i32, %c0_i32_0 : i32, i32, i32
  }
  func.func @transform_4(%arg0: i32) -> (i32, i32) {
    %c0_i32 = arith.constant 0 : i32
    %c0_i32_0 = arith.constant 0 : i32
    %c0_i32_1 = arith.constant 0 : i32
    return %c0_i32, %c0_i32_0 : i32, i32
  }
}

module attributes {stable_mosaic.version = 11 : i64} {
  func.func @_bn_act_conv_stats_kernel(%arg0: i32, %arg1: memref<1x17x272xbf16, #tpu.memory_space<vmem>>, %arg2: memref<17x272xf32, #tpu.memory_space<vmem>>, %arg3: memref<17x272xf32, #tpu.memory_space<vmem>>, %arg4: memref<272x128xbf16, #tpu.memory_space<vmem>>, %arg5: memref<272x128xbf16, #tpu.memory_space<vmem>>, %arg6: memref<1x16x128xbf16, #tpu.memory_space<vmem>>, %arg7: memref<2x128xf32, #tpu.memory_space<vmem>>) attributes {dimension_semantics = [#tpu.dimension_semantics<arbitrary>], iteration_bounds = array<i64: 2>, scalar_prefetch = 0 : i64, scratch_operands = 0 : i64, tpu.core_type = #tpu.core_type<tc>, window_params = [{transform_indices = @transform_0, window_bounds = array<i64: 1, 17, 272>}, {pipeline_mode = #tpu.pipeline_mode<synchronous>, transform_indices = @transform_1, window_bounds = array<i64: 17, 272>}, {pipeline_mode = #tpu.pipeline_mode<synchronous>, transform_indices = @transform_2, window_bounds = array<i64: 17, 272>}, {pipeline_mode = #tpu.pipeline_mode<synchronous>, transform_indices = @transform_3, window_bounds = array<i64: 272, 128>}, {pipeline_mode = #tpu.pipeline_mode<synchronous>, transform_indices = @transform_4, window_bounds = array<i64: 272, 128>}, {transform_indices = @transform_5, window_bounds = array<i64: 1, 16, 128>}, {pipeline_mode = #tpu.pipeline_mode<synchronous>, transform_indices = @transform_6, window_bounds = array<i64: 2, 128>}]} {
    %c0_i32 = arith.constant 0 : i32
    %0 = arith.cmpi eq, %arg0, %c0_i32 : i32
    %1 = arith.extui %0 : i1 to i32
    %c0_i32_0 = arith.constant 0 : i32
    %2 = arith.cmpi ne, %1, %c0_i32_0 : i32
    scf.if %2 {
      %cst_23 = arith.constant 0.000000e+00 : f32
      %36 = vector.broadcast %cst_23 : f32 to vector<2x128xf32>
      %c0_24 = arith.constant 0 : index
      %c0_25 = arith.constant 0 : index
      %37 = vector.load %arg7[%c0_24, %c0_25] : memref<2x128xf32, #tpu.memory_space<vmem>>, vector<2x128xf32>
      tpu.vector_store %arg7[%c0_24, %c0_25], %36 {strides = array<i32>} : memref<2x128xf32, #tpu.memory_space<vmem>>, vector<2x128xf32>,
    } else {
    }
    %c0 = arith.constant 0 : index
    %c0_1 = arith.constant 0 : index
    %c0_2 = arith.constant 0 : index
    %3 = vector.load %arg1[%c0, %c0_1, %c0_2] : memref<1x17x272xbf16, #tpu.memory_space<vmem>>, vector<1x17x272xbf16>
    %4 = vector.shape_cast %3 : vector<1x17x272xbf16> to vector<17x272xbf16>
    %5 = arith.extf %4 : vector<17x272xbf16> to vector<17x272xf32>
    %c0_3 = arith.constant 0 : index
    %c0_4 = arith.constant 0 : index
    %6 = vector.load %arg2[%c0_3, %c0_4] : memref<17x272xf32, #tpu.memory_space<vmem>>, vector<17x272xf32>
    %7 = arith.mulf %5, %6 : vector<17x272xf32>
    %c0_5 = arith.constant 0 : index
    %c0_6 = arith.constant 0 : index
    %8 = vector.load %arg3[%c0_5, %c0_6] : memref<17x272xf32, #tpu.memory_space<vmem>>, vector<17x272xf32>
    %9 = arith.addf %7, %8 : vector<17x272xf32>
    %cst = arith.constant 0.000000e+00 : f32
    %10 = vector.broadcast %cst : f32 to vector<17x272xf32>
    %11 = arith.cmpf oge, %9, %10 : vector<17x272xf32>
    %cst_7 = arith.constant 2.000000e-01 : f32
    %12 = vector.broadcast %cst_7 : f32 to vector<17x272xf32>
    %13 = arith.mulf %12, %9 : vector<17x272xf32>
    %14 = arith.select %11, %9, %13 : vector<17x272xi1>, vector<17x272xf32>
    %15 = arith.truncf %14 : vector<17x272xf32> to vector<17x272xbf16>
    %c0_8 = arith.constant 0 : index
    %c0_9 = arith.constant 0 : index
    %16 = vector.load %arg4[%c0_8, %c0_9] : memref<272x128xbf16, #tpu.memory_space<vmem>>, vector<272x128xbf16>
    %cst_10 = arith.constant dense<0.000000e+00> : vector<17x128xf32>
    %17 = tpu.matmul %15, %16, %cst_10 {dimension_numbers = #tpu.dot_dimension_numbers<[1], [0], [0], [1], [0, 0, 1, 1], [], []>} : vector<17x272xbf16>, vector<272x128xbf16>, vector<17x128xf32> -> vector<17x128xf32>
    %c0_11 = arith.constant 0 : index
    %c0_12 = arith.constant 0 : index
    %18 = vector.load %arg5[%c0_11, %c0_12] : memref<272x128xbf16, #tpu.memory_space<vmem>>, vector<272x128xbf16>
    %cst_13 = arith.constant dense<0.000000e+00> : vector<17x128xf32>
    %19 = tpu.matmul %15, %18, %cst_13 {dimension_numbers = #tpu.dot_dimension_numbers<[1], [0], [0], [1], [0, 0, 1, 1], [], []>} : vector<17x272xbf16>, vector<272x128xbf16>, vector<17x128xf32> -> vector<17x128xf32>
    %20 = vector.extract_strided_slice %17 {offsets = [0, 0], sizes = [16, 128], strides = [1, 1]} : vector<17x128xf32> to vector<16x128xf32>
    %21 = vector.extract_strided_slice %19 {offsets = [1, 0], sizes = [16, 128], strides = [1, 1]} : vector<17x128xf32> to vector<16x128xf32>
    %22 = arith.addf %20, %21 : vector<16x128xf32>
    %23 = arith.truncf %22 : vector<16x128xf32> to vector<16x128xbf16>
    %c0_14 = arith.constant 0 : index
    %c0_15 = arith.constant 0 : index
    %c0_16 = arith.constant 0 : index
    %24 = vector.load %arg6[%c0_14, %c0_15, %c0_16] : memref<1x16x128xbf16, #tpu.memory_space<vmem>>, vector<1x16x128xbf16>
    %25 = vector.shape_cast %24 : vector<1x16x128xbf16> to vector<16x128xbf16>
    %26 = vector.shape_cast %23 : vector<16x128xbf16> to vector<1x16x128xbf16>
    tpu.vector_store %arg6[%c0_14, %c0_15, %c0_16], %26 {strides = array<i32>} : memref<1x16x128xbf16, #tpu.memory_space<vmem>>, vector<1x16x128xbf16>,
    %cst_17 = arith.constant dense<0.000000e+00> : vector<128xf32>
    %27 = vector.multi_reduction <add>, %22, %cst_17 [0] : vector<16x128xf32> to vector<128xf32>
    %28 = vector.shape_cast %27 : vector<128xf32> to vector<1x128xf32>
    %29 = arith.mulf %22, %22 : vector<16x128xf32>
    %cst_18 = arith.constant dense<0.000000e+00> : vector<128xf32>
    %30 = vector.multi_reduction <add>, %29, %cst_18 [0] : vector<16x128xf32> to vector<128xf32>
    %31 = vector.shape_cast %30 : vector<128xf32> to vector<1x128xf32>
    %c0_19 = arith.constant 0 : index
    %c0_20 = arith.constant 0 : index
    %32 = vector.load %arg7[%c0_19, %c0_20] : memref<2x128xf32, #tpu.memory_space<vmem>>, vector<2x128xf32>
    %33 = tpu.concatenate %28, %31 in 0 : vector<1x128xf32>, vector<1x128xf32> -> vector<2x128xf32>
    %34 = arith.addf %32, %33 : vector<2x128xf32>
    %c0_21 = arith.constant 0 : index
    %c0_22 = arith.constant 0 : index
    %35 = vector.load %arg7[%c0_21, %c0_22] : memref<2x128xf32, #tpu.memory_space<vmem>>, vector<2x128xf32>
    tpu.vector_store %arg7[%c0_21, %c0_22], %34 {strides = array<i32>} : memref<2x128xf32, #tpu.memory_space<vmem>>, vector<2x128xf32>,
    return
  }
  func.func @transform_0(%arg0: i32) -> (i32, i32, i32) {
    %c0_i32 = arith.constant 0 : i32
    %c0_i32_0 = arith.constant 0 : i32
    %c0_i32_1 = arith.constant 0 : i32
    return %arg0, %c0_i32, %c0_i32_0 : i32, i32, i32
  }
  func.func @transform_1(%arg0: i32) -> (i32, i32) {
    %c0_i32 = arith.constant 0 : i32
    %c0_i32_0 = arith.constant 0 : i32
    %c0_i32_1 = arith.constant 0 : i32
    return %c0_i32, %c0_i32_0 : i32, i32
  }
  func.func @transform_2(%arg0: i32) -> (i32, i32) {
    %c0_i32 = arith.constant 0 : i32
    %c0_i32_0 = arith.constant 0 : i32
    %c0_i32_1 = arith.constant 0 : i32
    return %c0_i32, %c0_i32_0 : i32, i32
  }
  func.func @transform_3(%arg0: i32) -> (i32, i32) {
    %c0_i32 = arith.constant 0 : i32
    %c0_i32_0 = arith.constant 0 : i32
    %c0_i32_1 = arith.constant 0 : i32
    return %c0_i32, %c0_i32_0 : i32, i32
  }
  func.func @transform_4(%arg0: i32) -> (i32, i32) {
    %c0_i32 = arith.constant 0 : i32
    %c0_i32_0 = arith.constant 0 : i32
    %c0_i32_1 = arith.constant 0 : i32
    return %c0_i32, %c0_i32_0 : i32, i32
  }
  func.func @transform_5(%arg0: i32) -> (i32, i32, i32) {
    %c0_i32 = arith.constant 0 : i32
    %c0_i32_0 = arith.constant 0 : i32
    %c0_i32_1 = arith.constant 0 : i32
    return %arg0, %c0_i32, %c0_i32_0 : i32, i32, i32
  }
  func.func @transform_6(%arg0: i32) -> (i32, i32) {
    %c0_i32 = arith.constant 0 : i32
    %c0_i32_0 = arith.constant 0 : i32
    %c0_i32_1 = arith.constant 0 : i32
    return %c0_i32, %c0_i32_0 : i32, i32
  }
}

module attributes {stable_mosaic.version = 11 : i64} {
  func.func @_bn_act_conv_stats_kernel(%arg0: i32, %arg1: memref<1x9x288xbf16, #tpu.memory_space<vmem>>, %arg2: memref<9x288xf32, #tpu.memory_space<vmem>>, %arg3: memref<9x288xf32, #tpu.memory_space<vmem>>, %arg4: memref<288x128xbf16, #tpu.memory_space<vmem>>, %arg5: memref<288x128xbf16, #tpu.memory_space<vmem>>, %arg6: memref<1x8x128xbf16, #tpu.memory_space<vmem>>, %arg7: memref<2x128xf32, #tpu.memory_space<vmem>>) attributes {dimension_semantics = [#tpu.dimension_semantics<arbitrary>], iteration_bounds = array<i64: 2>, scalar_prefetch = 0 : i64, scratch_operands = 0 : i64, tpu.core_type = #tpu.core_type<tc>, window_params = [{transform_indices = @transform_0, window_bounds = array<i64: 1, 9, 288>}, {pipeline_mode = #tpu.pipeline_mode<synchronous>, transform_indices = @transform_1, window_bounds = array<i64: 9, 288>}, {pipeline_mode = #tpu.pipeline_mode<synchronous>, transform_indices = @transform_2, window_bounds = array<i64: 9, 288>}, {pipeline_mode = #tpu.pipeline_mode<synchronous>, transform_indices = @transform_3, window_bounds = array<i64: 288, 128>}, {pipeline_mode = #tpu.pipeline_mode<synchronous>, transform_indices = @transform_4, window_bounds = array<i64: 288, 128>}, {transform_indices = @transform_5, window_bounds = array<i64: 1, 8, 128>}, {pipeline_mode = #tpu.pipeline_mode<synchronous>, transform_indices = @transform_6, window_bounds = array<i64: 2, 128>}]} {
    %c0_i32 = arith.constant 0 : i32
    %0 = arith.cmpi eq, %arg0, %c0_i32 : i32
    %1 = arith.extui %0 : i1 to i32
    %c0_i32_0 = arith.constant 0 : i32
    %2 = arith.cmpi ne, %1, %c0_i32_0 : i32
    scf.if %2 {
      %cst_23 = arith.constant 0.000000e+00 : f32
      %36 = vector.broadcast %cst_23 : f32 to vector<2x128xf32>
      %c0_24 = arith.constant 0 : index
      %c0_25 = arith.constant 0 : index
      %37 = vector.load %arg7[%c0_24, %c0_25] : memref<2x128xf32, #tpu.memory_space<vmem>>, vector<2x128xf32>
      tpu.vector_store %arg7[%c0_24, %c0_25], %36 {strides = array<i32>} : memref<2x128xf32, #tpu.memory_space<vmem>>, vector<2x128xf32>,
    } else {
    }
    %c0 = arith.constant 0 : index
    %c0_1 = arith.constant 0 : index
    %c0_2 = arith.constant 0 : index
    %3 = vector.load %arg1[%c0, %c0_1, %c0_2] : memref<1x9x288xbf16, #tpu.memory_space<vmem>>, vector<1x9x288xbf16>
    %4 = vector.shape_cast %3 : vector<1x9x288xbf16> to vector<9x288xbf16>
    %5 = arith.extf %4 : vector<9x288xbf16> to vector<9x288xf32>
    %c0_3 = arith.constant 0 : index
    %c0_4 = arith.constant 0 : index
    %6 = vector.load %arg2[%c0_3, %c0_4] : memref<9x288xf32, #tpu.memory_space<vmem>>, vector<9x288xf32>
    %7 = arith.mulf %5, %6 : vector<9x288xf32>
    %c0_5 = arith.constant 0 : index
    %c0_6 = arith.constant 0 : index
    %8 = vector.load %arg3[%c0_5, %c0_6] : memref<9x288xf32, #tpu.memory_space<vmem>>, vector<9x288xf32>
    %9 = arith.addf %7, %8 : vector<9x288xf32>
    %cst = arith.constant 0.000000e+00 : f32
    %10 = vector.broadcast %cst : f32 to vector<9x288xf32>
    %11 = arith.cmpf oge, %9, %10 : vector<9x288xf32>
    %cst_7 = arith.constant 2.000000e-01 : f32
    %12 = vector.broadcast %cst_7 : f32 to vector<9x288xf32>
    %13 = arith.mulf %12, %9 : vector<9x288xf32>
    %14 = arith.select %11, %9, %13 : vector<9x288xi1>, vector<9x288xf32>
    %15 = arith.truncf %14 : vector<9x288xf32> to vector<9x288xbf16>
    %c0_8 = arith.constant 0 : index
    %c0_9 = arith.constant 0 : index
    %16 = vector.load %arg4[%c0_8, %c0_9] : memref<288x128xbf16, #tpu.memory_space<vmem>>, vector<288x128xbf16>
    %cst_10 = arith.constant dense<0.000000e+00> : vector<9x128xf32>
    %17 = tpu.matmul %15, %16, %cst_10 {dimension_numbers = #tpu.dot_dimension_numbers<[1], [0], [0], [1], [0, 0, 1, 1], [], []>} : vector<9x288xbf16>, vector<288x128xbf16>, vector<9x128xf32> -> vector<9x128xf32>
    %c0_11 = arith.constant 0 : index
    %c0_12 = arith.constant 0 : index
    %18 = vector.load %arg5[%c0_11, %c0_12] : memref<288x128xbf16, #tpu.memory_space<vmem>>, vector<288x128xbf16>
    %cst_13 = arith.constant dense<0.000000e+00> : vector<9x128xf32>
    %19 = tpu.matmul %15, %18, %cst_13 {dimension_numbers = #tpu.dot_dimension_numbers<[1], [0], [0], [1], [0, 0, 1, 1], [], []>} : vector<9x288xbf16>, vector<288x128xbf16>, vector<9x128xf32> -> vector<9x128xf32>
    %20 = vector.extract_strided_slice %17 {offsets = [0, 0], sizes = [8, 128], strides = [1, 1]} : vector<9x128xf32> to vector<8x128xf32>
    %21 = vector.extract_strided_slice %19 {offsets = [1, 0], sizes = [8, 128], strides = [1, 1]} : vector<9x128xf32> to vector<8x128xf32>
    %22 = arith.addf %20, %21 : vector<8x128xf32>
    %23 = arith.truncf %22 : vector<8x128xf32> to vector<8x128xbf16>
    %c0_14 = arith.constant 0 : index
    %c0_15 = arith.constant 0 : index
    %c0_16 = arith.constant 0 : index
    %24 = vector.load %arg6[%c0_14, %c0_15, %c0_16] : memref<1x8x128xbf16, #tpu.memory_space<vmem>>, vector<1x8x128xbf16>
    %25 = vector.shape_cast %24 : vector<1x8x128xbf16> to vector<8x128xbf16>
    %26 = vector.shape_cast %23 : vector<8x128xbf16> to vector<1x8x128xbf16>
    tpu.vector_store %arg6[%c0_14, %c0_15, %c0_16], %26 {strides = array<i32>} : memref<1x8x128xbf16, #tpu.memory_space<vmem>>, vector<1x8x128xbf16>,
    %cst_17 = arith.constant dense<0.000000e+00> : vector<128xf32>
    %27 = vector.multi_reduction <add>, %22, %cst_17 [0] : vector<8x128xf32> to vector<128xf32>
    %28 = vector.shape_cast %27 : vector<128xf32> to vector<1x128xf32>
    %29 = arith.mulf %22, %22 : vector<8x128xf32>
    %cst_18 = arith.constant dense<0.000000e+00> : vector<128xf32>
    %30 = vector.multi_reduction <add>, %29, %cst_18 [0] : vector<8x128xf32> to vector<128xf32>
    %31 = vector.shape_cast %30 : vector<128xf32> to vector<1x128xf32>
    %c0_19 = arith.constant 0 : index
    %c0_20 = arith.constant 0 : index
    %32 = vector.load %arg7[%c0_19, %c0_20] : memref<2x128xf32, #tpu.memory_space<vmem>>, vector<2x128xf32>
    %33 = tpu.concatenate %28, %31 in 0 : vector<1x128xf32>, vector<1x128xf32> -> vector<2x128xf32>
    %34 = arith.addf %32, %33 : vector<2x128xf32>
    %c0_21 = arith.constant 0 : index
    %c0_22 = arith.constant 0 : index
    %35 = vector.load %arg7[%c0_21, %c0_22] : memref<2x128xf32, #tpu.memory_space<vmem>>, vector<2x128xf32>
    tpu.vector_store %arg7[%c0_21, %c0_22], %34 {strides = array<i32>} : memref<2x128xf32, #tpu.memory_space<vmem>>, vector<2x128xf32>,
    return
  }
  func.func @transform_0(%arg0: i32) -> (i32, i32, i32) {
    %c0_i32 = arith.constant 0 : i32
    %c0_i32_0 = arith.constant 0 : i32
    %c0_i32_1 = arith.constant 0 : i32
    return %arg0, %c0_i32, %c0_i32_0 : i32, i32, i32
  }
  func.func @transform_1(%arg0: i32) -> (i32, i32) {
    %c0_i32 = arith.constant 0 : i32
    %c0_i32_0 = arith.constant 0 : i32
    %c0_i32_1 = arith.constant 0 : i32
    return %c0_i32, %c0_i32_0 : i32, i32
  }
  func.func @transform_2(%arg0: i32) -> (i32, i32) {
    %c0_i32 = arith.constant 0 : i32
    %c0_i32_0 = arith.constant 0 : i32
    %c0_i32_1 = arith.constant 0 : i32
    return %c0_i32, %c0_i32_0 : i32, i32
  }
  func.func @transform_3(%arg0: i32) -> (i32, i32) {
    %c0_i32 = arith.constant 0 : i32
    %c0_i32_0 = arith.constant 0 : i32
    %c0_i32_1 = arith.constant 0 : i32
    return %c0_i32, %c0_i32_0 : i32, i32
  }
  func.func @transform_4(%arg0: i32) -> (i32, i32) {
    %c0_i32 = arith.constant 0 : i32
    %c0_i32_0 = arith.constant 0 : i32
    %c0_i32_1 = arith.constant 0 : i32
    return %c0_i32, %c0_i32_0 : i32, i32
  }
  func.func @transform_5(%arg0: i32) -> (i32, i32, i32) {
    %c0_i32 = arith.constant 0 : i32
    %c0_i32_0 = arith.constant 0 : i32
    %c0_i32_1 = arith.constant 0 : i32
    return %arg0, %c0_i32, %c0_i32_0 : i32, i32, i32
  }
  func.func @transform_6(%arg0: i32) -> (i32, i32) {
    %c0_i32 = arith.constant 0 : i32
    %c0_i32_0 = arith.constant 0 : i32
    %c0_i32_1 = arith.constant 0 : i32
    return %c0_i32, %c0_i32_0 : i32, i32
  }
}

module attributes {stable_mosaic.version = 11 : i64} {
  func.func @_bn_act_conv_stats_kernel(%arg0: i32, %arg1: memref<1x5x320xbf16, #tpu.memory_space<vmem>>, %arg2: memref<5x320xf32, #tpu.memory_space<vmem>>, %arg3: memref<5x320xf32, #tpu.memory_space<vmem>>, %arg4: memref<320x128xbf16, #tpu.memory_space<vmem>>, %arg5: memref<320x128xbf16, #tpu.memory_space<vmem>>, %arg6: memref<1x4x128xbf16, #tpu.memory_space<vmem>>, %arg7: memref<2x128xf32, #tpu.memory_space<vmem>>) attributes {dimension_semantics = [#tpu.dimension_semantics<arbitrary>], iteration_bounds = array<i64: 2>, scalar_prefetch = 0 : i64, scratch_operands = 0 : i64, tpu.core_type = #tpu.core_type<tc>, window_params = [{transform_indices = @transform_0, window_bounds = array<i64: 1, 5, 320>}, {pipeline_mode = #tpu.pipeline_mode<synchronous>, transform_indices = @transform_1, window_bounds = array<i64: 5, 320>}, {pipeline_mode = #tpu.pipeline_mode<synchronous>, transform_indices = @transform_2, window_bounds = array<i64: 5, 320>}, {pipeline_mode = #tpu.pipeline_mode<synchronous>, transform_indices = @transform_3, window_bounds = array<i64: 320, 128>}, {pipeline_mode = #tpu.pipeline_mode<synchronous>, transform_indices = @transform_4, window_bounds = array<i64: 320, 128>}, {transform_indices = @transform_5, window_bounds = array<i64: 1, 4, 128>}, {pipeline_mode = #tpu.pipeline_mode<synchronous>, transform_indices = @transform_6, window_bounds = array<i64: 2, 128>}]} {
    %c0_i32 = arith.constant 0 : i32
    %0 = arith.cmpi eq, %arg0, %c0_i32 : i32
    %1 = arith.extui %0 : i1 to i32
    %c0_i32_0 = arith.constant 0 : i32
    %2 = arith.cmpi ne, %1, %c0_i32_0 : i32
    scf.if %2 {
      %cst_23 = arith.constant 0.000000e+00 : f32
      %36 = vector.broadcast %cst_23 : f32 to vector<2x128xf32>
      %c0_24 = arith.constant 0 : index
      %c0_25 = arith.constant 0 : index
      %37 = vector.load %arg7[%c0_24, %c0_25] : memref<2x128xf32, #tpu.memory_space<vmem>>, vector<2x128xf32>
      tpu.vector_store %arg7[%c0_24, %c0_25], %36 {strides = array<i32>} : memref<2x128xf32, #tpu.memory_space<vmem>>, vector<2x128xf32>,
    } else {
    }
    %c0 = arith.constant 0 : index
    %c0_1 = arith.constant 0 : index
    %c0_2 = arith.constant 0 : index
    %3 = vector.load %arg1[%c0, %c0_1, %c0_2] : memref<1x5x320xbf16, #tpu.memory_space<vmem>>, vector<1x5x320xbf16>
    %4 = vector.shape_cast %3 : vector<1x5x320xbf16> to vector<5x320xbf16>
    %5 = arith.extf %4 : vector<5x320xbf16> to vector<5x320xf32>
    %c0_3 = arith.constant 0 : index
    %c0_4 = arith.constant 0 : index
    %6 = vector.load %arg2[%c0_3, %c0_4] : memref<5x320xf32, #tpu.memory_space<vmem>>, vector<5x320xf32>
    %7 = arith.mulf %5, %6 : vector<5x320xf32>
    %c0_5 = arith.constant 0 : index
    %c0_6 = arith.constant 0 : index
    %8 = vector.load %arg3[%c0_5, %c0_6] : memref<5x320xf32, #tpu.memory_space<vmem>>, vector<5x320xf32>
    %9 = arith.addf %7, %8 : vector<5x320xf32>
    %cst = arith.constant 0.000000e+00 : f32
    %10 = vector.broadcast %cst : f32 to vector<5x320xf32>
    %11 = arith.cmpf oge, %9, %10 : vector<5x320xf32>
    %cst_7 = arith.constant 2.000000e-01 : f32
    %12 = vector.broadcast %cst_7 : f32 to vector<5x320xf32>
    %13 = arith.mulf %12, %9 : vector<5x320xf32>
    %14 = arith.select %11, %9, %13 : vector<5x320xi1>, vector<5x320xf32>
    %15 = arith.truncf %14 : vector<5x320xf32> to vector<5x320xbf16>
    %c0_8 = arith.constant 0 : index
    %c0_9 = arith.constant 0 : index
    %16 = vector.load %arg4[%c0_8, %c0_9] : memref<320x128xbf16, #tpu.memory_space<vmem>>, vector<320x128xbf16>
    %cst_10 = arith.constant dense<0.000000e+00> : vector<5x128xf32>
    %17 = tpu.matmul %15, %16, %cst_10 {dimension_numbers = #tpu.dot_dimension_numbers<[1], [0], [0], [1], [0, 0, 1, 1], [], []>} : vector<5x320xbf16>, vector<320x128xbf16>, vector<5x128xf32> -> vector<5x128xf32>
    %c0_11 = arith.constant 0 : index
    %c0_12 = arith.constant 0 : index
    %18 = vector.load %arg5[%c0_11, %c0_12] : memref<320x128xbf16, #tpu.memory_space<vmem>>, vector<320x128xbf16>
    %cst_13 = arith.constant dense<0.000000e+00> : vector<5x128xf32>
    %19 = tpu.matmul %15, %18, %cst_13 {dimension_numbers = #tpu.dot_dimension_numbers<[1], [0], [0], [1], [0, 0, 1, 1], [], []>} : vector<5x320xbf16>, vector<320x128xbf16>, vector<5x128xf32> -> vector<5x128xf32>
    %20 = vector.extract_strided_slice %17 {offsets = [0, 0], sizes = [4, 128], strides = [1, 1]} : vector<5x128xf32> to vector<4x128xf32>
    %21 = vector.extract_strided_slice %19 {offsets = [1, 0], sizes = [4, 128], strides = [1, 1]} : vector<5x128xf32> to vector<4x128xf32>
    %22 = arith.addf %20, %21 : vector<4x128xf32>
    %23 = arith.truncf %22 : vector<4x128xf32> to vector<4x128xbf16>
    %c0_14 = arith.constant 0 : index
    %c0_15 = arith.constant 0 : index
    %c0_16 = arith.constant 0 : index
    %24 = vector.load %arg6[%c0_14, %c0_15, %c0_16] : memref<1x4x128xbf16, #tpu.memory_space<vmem>>, vector<1x4x128xbf16>
    %25 = vector.shape_cast %24 : vector<1x4x128xbf16> to vector<4x128xbf16>
    %26 = vector.shape_cast %23 : vector<4x128xbf16> to vector<1x4x128xbf16>
    tpu.vector_store %arg6[%c0_14, %c0_15, %c0_16], %26 {strides = array<i32>} : memref<1x4x128xbf16, #tpu.memory_space<vmem>>, vector<1x4x128xbf16>,
    %cst_17 = arith.constant dense<0.000000e+00> : vector<128xf32>
    %27 = vector.multi_reduction <add>, %22, %cst_17 [0] : vector<4x128xf32> to vector<128xf32>
    %28 = vector.shape_cast %27 : vector<128xf32> to vector<1x128xf32>
    %29 = arith.mulf %22, %22 : vector<4x128xf32>
    %cst_18 = arith.constant dense<0.000000e+00> : vector<128xf32>
    %30 = vector.multi_reduction <add>, %29, %cst_18 [0] : vector<4x128xf32> to vector<128xf32>
    %31 = vector.shape_cast %30 : vector<128xf32> to vector<1x128xf32>
    %c0_19 = arith.constant 0 : index
    %c0_20 = arith.constant 0 : index
    %32 = vector.load %arg7[%c0_19, %c0_20] : memref<2x128xf32, #tpu.memory_space<vmem>>, vector<2x128xf32>
    %33 = tpu.concatenate %28, %31 in 0 : vector<1x128xf32>, vector<1x128xf32> -> vector<2x128xf32>
    %34 = arith.addf %32, %33 : vector<2x128xf32>
    %c0_21 = arith.constant 0 : index
    %c0_22 = arith.constant 0 : index
    %35 = vector.load %arg7[%c0_21, %c0_22] : memref<2x128xf32, #tpu.memory_space<vmem>>, vector<2x128xf32>
    tpu.vector_store %arg7[%c0_21, %c0_22], %34 {strides = array<i32>} : memref<2x128xf32, #tpu.memory_space<vmem>>, vector<2x128xf32>,
    return
  }
  func.func @transform_0(%arg0: i32) -> (i32, i32, i32) {
    %c0_i32 = arith.constant 0 : i32
    %c0_i32_0 = arith.constant 0 : i32
    %c0_i32_1 = arith.constant 0 : i32
    return %arg0, %c0_i32, %c0_i32_0 : i32, i32, i32
  }
  func.func @transform_1(%arg0: i32) -> (i32, i32) {
    %c0_i32 = arith.constant 0 : i32
    %c0_i32_0 = arith.constant 0 : i32
    %c0_i32_1 = arith.constant 0 : i32
    return %c0_i32, %c0_i32_0 : i32, i32
  }
  func.func @transform_2(%arg0: i32) -> (i32, i32) {
    %c0_i32 = arith.constant 0 : i32
    %c0_i32_0 = arith.constant 0 : i32
    %c0_i32_1 = arith.constant 0 : i32
    return %c0_i32, %c0_i32_0 : i32, i32
  }
  func.func @transform_3(%arg0: i32) -> (i32, i32) {
    %c0_i32 = arith.constant 0 : i32
    %c0_i32_0 = arith.constant 0 : i32
    %c0_i32_1 = arith.constant 0 : i32
    return %c0_i32, %c0_i32_0 : i32, i32
  }
  func.func @transform_4(%arg0: i32) -> (i32, i32) {
    %c0_i32 = arith.constant 0 : i32
    %c0_i32_0 = arith.constant 0 : i32
    %c0_i32_1 = arith.constant 0 : i32
    return %c0_i32, %c0_i32_0 : i32, i32
  }
  func.func @transform_5(%arg0: i32) -> (i32, i32, i32) {
    %c0_i32 = arith.constant 0 : i32
    %c0_i32_0 = arith.constant 0 : i32
    %c0_i32_1 = arith.constant 0 : i32
    return %arg0, %c0_i32, %c0_i32_0 : i32, i32, i32
  }
  func.func @transform_6(%arg0: i32) -> (i32, i32) {
    %c0_i32 = arith.constant 0 : i32
    %c0_i32_0 = arith.constant 0 : i32
    %c0_i32_1 = arith.constant 0 : i32
    return %c0_i32, %c0_i32_0 : i32, i32
  }
}

module attributes {stable_mosaic.version = 11 : i64} {
  func.func @_head_kernel(%arg0: memref<2x4x128xbf16, #tpu.memory_space<vmem>>, %arg1: memref<1x128xf32, #tpu.memory_space<vmem>>, %arg2: memref<1x128xf32, #tpu.memory_space<vmem>>, %arg3: memref<4x128x64xbf16, #tpu.memory_space<vmem>>, %arg4: memref<1x64xf32, #tpu.memory_space<vmem>>, %arg5: memref<1x64xf32, #tpu.memory_space<vmem>>, %arg6: memref<1x1xf32, #tpu.memory_space<vmem>>, %arg7: memref<2x1xf32, #tpu.memory_space<vmem>>) attributes {dimension_semantics = [], scalar_prefetch = 0 : i64, scratch_operands = 0 : i64, tpu.core_type = #tpu.core_type<tc>} {
    %cst = arith.constant 0.000000e+00 : f32
    %0 = vector.broadcast %cst : f32 to vector<2x64xf32>
    %c0 = arith.constant 0 : index
    %c0_0 = arith.constant 0 : index
    %c0_1 = arith.constant 0 : index
    %1 = vector.load %arg0[%c0, %c0_0, %c0_1] : memref<2x4x128xbf16, #tpu.memory_space<vmem>>, vector<2x1x128xbf16>
    %2 = vector.shape_cast %1 : vector<2x1x128xbf16> to vector<2x128xbf16>
    %c0_2 = arith.constant 0 : index
    %c0_3 = arith.constant 0 : index
    %3 = vector.load %arg1[%c0_2, %c0_3] : memref<1x128xf32, #tpu.memory_space<vmem>>, vector<1x128xf32>
    %4 = arith.extf %2 : vector<2x128xbf16> to vector<2x128xf32>
    %5 = vector.broadcast %3 : vector<1x128xf32> to vector<2x128xf32>
    %6 = arith.mulf %4, %5 : vector<2x128xf32>
    %c0_4 = arith.constant 0 : index
    %c0_5 = arith.constant 0 : index
    %7 = vector.load %arg2[%c0_4, %c0_5] : memref<1x128xf32, #tpu.memory_space<vmem>>, vector<1x128xf32>
    %8 = vector.broadcast %7 : vector<1x128xf32> to vector<2x128xf32>
    %9 = arith.addf %6, %8 : vector<2x128xf32>
    %cst_6 = arith.constant 0.000000e+00 : f32
    %10 = vector.broadcast %cst_6 : f32 to vector<2x128xf32>
    %11 = arith.cmpf oge, %9, %10 : vector<2x128xf32>
    %cst_7 = arith.constant 2.000000e-01 : f32
    %12 = vector.broadcast %cst_7 : f32 to vector<2x128xf32>
    %13 = arith.mulf %12, %9 : vector<2x128xf32>
    %14 = arith.select %11, %9, %13 : vector<2x128xi1>, vector<2x128xf32>
    %15 = arith.truncf %14 : vector<2x128xf32> to vector<2x128xbf16>
    %c0_8 = arith.constant 0 : index
    %c0_9 = arith.constant 0 : index
    %c0_10 = arith.constant 0 : index
    %16 = vector.load %arg3[%c0_8, %c0_9, %c0_10] : memref<4x128x64xbf16, #tpu.memory_space<vmem>>, vector<1x128x64xbf16>
    %17 = vector.shape_cast %16 : vector<1x128x64xbf16> to vector<128x64xbf16>
    %cst_11 = arith.constant dense<0.000000e+00> : vector<2x64xf32>
    %18 = tpu.matmul %15, %17, %cst_11 {dimension_numbers = #tpu.dot_dimension_numbers<[1], [0], [0], [1], [0, 0, 1, 1], [], []>} : vector<2x128xbf16>, vector<128x64xbf16>, vector<2x64xf32> -> vector<2x64xf32>
    %19 = arith.addf %0, %18 : vector<2x64xf32>
    %c0_12 = arith.constant 0 : index
    %c1 = arith.constant 1 : index
    %c0_13 = arith.constant 0 : index
    %20 = vector.load %arg0[%c0_12, %c1, %c0_13] : memref<2x4x128xbf16, #tpu.memory_space<vmem>>, vector<2x1x128xbf16>
    %21 = vector.shape_cast %20 : vector<2x1x128xbf16> to vector<2x128xbf16>
    %c0_14 = arith.constant 0 : index
    %c0_15 = arith.constant 0 : index
    %22 = vector.load %arg1[%c0_14, %c0_15] : memref<1x128xf32, #tpu.memory_space<vmem>>, vector<1x128xf32>
    %23 = arith.extf %21 : vector<2x128xbf16> to vector<2x128xf32>
    %24 = vector.broadcast %22 : vector<1x128xf32> to vector<2x128xf32>
    %25 = arith.mulf %23, %24 : vector<2x128xf32>
    %c0_16 = arith.constant 0 : index
    %c0_17 = arith.constant 0 : index
    %26 = vector.load %arg2[%c0_16, %c0_17] : memref<1x128xf32, #tpu.memory_space<vmem>>, vector<1x128xf32>
    %27 = vector.broadcast %26 : vector<1x128xf32> to vector<2x128xf32>
    %28 = arith.addf %25, %27 : vector<2x128xf32>
    %cst_18 = arith.constant 0.000000e+00 : f32
    %29 = vector.broadcast %cst_18 : f32 to vector<2x128xf32>
    %30 = arith.cmpf oge, %28, %29 : vector<2x128xf32>
    %cst_19 = arith.constant 2.000000e-01 : f32
    %31 = vector.broadcast %cst_19 : f32 to vector<2x128xf32>
    %32 = arith.mulf %31, %28 : vector<2x128xf32>
    %33 = arith.select %30, %28, %32 : vector<2x128xi1>, vector<2x128xf32>
    %34 = arith.truncf %33 : vector<2x128xf32> to vector<2x128xbf16>
    %c1_20 = arith.constant 1 : index
    %c0_21 = arith.constant 0 : index
    %c0_22 = arith.constant 0 : index
    %35 = vector.load %arg3[%c1_20, %c0_21, %c0_22] : memref<4x128x64xbf16, #tpu.memory_space<vmem>>, vector<1x128x64xbf16>
    %36 = vector.shape_cast %35 : vector<1x128x64xbf16> to vector<128x64xbf16>
    %cst_23 = arith.constant dense<0.000000e+00> : vector<2x64xf32>
    %37 = tpu.matmul %34, %36, %cst_23 {dimension_numbers = #tpu.dot_dimension_numbers<[1], [0], [0], [1], [0, 0, 1, 1], [], []>} : vector<2x128xbf16>, vector<128x64xbf16>, vector<2x64xf32> -> vector<2x64xf32>
    %38 = arith.addf %19, %37 : vector<2x64xf32>
    %c0_24 = arith.constant 0 : index
    %c2 = arith.constant 2 : index
    %c0_25 = arith.constant 0 : index
    %39 = vector.load %arg0[%c0_24, %c2, %c0_25] : memref<2x4x128xbf16, #tpu.memory_space<vmem>>, vector<2x1x128xbf16>
    %40 = vector.shape_cast %39 : vector<2x1x128xbf16> to vector<2x128xbf16>
    %c0_26 = arith.constant 0 : index
    %c0_27 = arith.constant 0 : index
    %41 = vector.load %arg1[%c0_26, %c0_27] : memref<1x128xf32, #tpu.memory_space<vmem>>, vector<1x128xf32>
    %42 = arith.extf %40 : vector<2x128xbf16> to vector<2x128xf32>
    %43 = vector.broadcast %41 : vector<1x128xf32> to vector<2x128xf32>
    %44 = arith.mulf %42, %43 : vector<2x128xf32>
    %c0_28 = arith.constant 0 : index
    %c0_29 = arith.constant 0 : index
    %45 = vector.load %arg2[%c0_28, %c0_29] : memref<1x128xf32, #tpu.memory_space<vmem>>, vector<1x128xf32>
    %46 = vector.broadcast %45 : vector<1x128xf32> to vector<2x128xf32>
    %47 = arith.addf %44, %46 : vector<2x128xf32>
    %cst_30 = arith.constant 0.000000e+00 : f32
    %48 = vector.broadcast %cst_30 : f32 to vector<2x128xf32>
    %49 = arith.cmpf oge, %47, %48 : vector<2x128xf32>
    %cst_31 = arith.constant 2.000000e-01 : f32
    %50 = vector.broadcast %cst_31 : f32 to vector<2x128xf32>
    %51 = arith.mulf %50, %47 : vector<2x128xf32>
    %52 = arith.select %49, %47, %51 : vector<2x128xi1>, vector<2x128xf32>
    %53 = arith.truncf %52 : vector<2x128xf32> to vector<2x128xbf16>
    %c2_32 = arith.constant 2 : index
    %c0_33 = arith.constant 0 : index
    %c0_34 = arith.constant 0 : index
    %54 = vector.load %arg3[%c2_32, %c0_33, %c0_34] : memref<4x128x64xbf16, #tpu.memory_space<vmem>>, vector<1x128x64xbf16>
    %55 = vector.shape_cast %54 : vector<1x128x64xbf16> to vector<128x64xbf16>
    %cst_35 = arith.constant dense<0.000000e+00> : vector<2x64xf32>
    %56 = tpu.matmul %53, %55, %cst_35 {dimension_numbers = #tpu.dot_dimension_numbers<[1], [0], [0], [1], [0, 0, 1, 1], [], []>} : vector<2x128xbf16>, vector<128x64xbf16>, vector<2x64xf32> -> vector<2x64xf32>
    %57 = arith.addf %38, %56 : vector<2x64xf32>
    %c0_36 = arith.constant 0 : index
    %c3 = arith.constant 3 : index
    %c0_37 = arith.constant 0 : index
    %58 = vector.load %arg0[%c0_36, %c3, %c0_37] : memref<2x4x128xbf16, #tpu.memory_space<vmem>>, vector<2x1x128xbf16>
    %59 = vector.shape_cast %58 : vector<2x1x128xbf16> to vector<2x128xbf16>
    %c0_38 = arith.constant 0 : index
    %c0_39 = arith.constant 0 : index
    %60 = vector.load %arg1[%c0_38, %c0_39] : memref<1x128xf32, #tpu.memory_space<vmem>>, vector<1x128xf32>
    %61 = arith.extf %59 : vector<2x128xbf16> to vector<2x128xf32>
    %62 = vector.broadcast %60 : vector<1x128xf32> to vector<2x128xf32>
    %63 = arith.mulf %61, %62 : vector<2x128xf32>
    %c0_40 = arith.constant 0 : index
    %c0_41 = arith.constant 0 : index
    %64 = vector.load %arg2[%c0_40, %c0_41] : memref<1x128xf32, #tpu.memory_space<vmem>>, vector<1x128xf32>
    %65 = vector.broadcast %64 : vector<1x128xf32> to vector<2x128xf32>
    %66 = arith.addf %63, %65 : vector<2x128xf32>
    %cst_42 = arith.constant 0.000000e+00 : f32
    %67 = vector.broadcast %cst_42 : f32 to vector<2x128xf32>
    %68 = arith.cmpf oge, %66, %67 : vector<2x128xf32>
    %cst_43 = arith.constant 2.000000e-01 : f32
    %69 = vector.broadcast %cst_43 : f32 to vector<2x128xf32>
    %70 = arith.mulf %69, %66 : vector<2x128xf32>
    %71 = arith.select %68, %66, %70 : vector<2x128xi1>, vector<2x128xf32>
    %72 = arith.truncf %71 : vector<2x128xf32> to vector<2x128xbf16>
    %c3_44 = arith.constant 3 : index
    %c0_45 = arith.constant 0 : index
    %c0_46 = arith.constant 0 : index
    %73 = vector.load %arg3[%c3_44, %c0_45, %c0_46] : memref<4x128x64xbf16, #tpu.memory_space<vmem>>, vector<1x128x64xbf16>
    %74 = vector.shape_cast %73 : vector<1x128x64xbf16> to vector<128x64xbf16>
    %cst_47 = arith.constant dense<0.000000e+00> : vector<2x64xf32>
    %75 = tpu.matmul %72, %74, %cst_47 {dimension_numbers = #tpu.dot_dimension_numbers<[1], [0], [0], [1], [0, 0, 1, 1], [], []>} : vector<2x128xbf16>, vector<128x64xbf16>, vector<2x64xf32> -> vector<2x64xf32>
    %76 = arith.addf %57, %75 : vector<2x64xf32>
    %c0_48 = arith.constant 0 : index
    %c0_49 = arith.constant 0 : index
    %77 = vector.load %arg4[%c0_48, %c0_49] : memref<1x64xf32, #tpu.memory_space<vmem>>, vector<1x64xf32>
    %78 = vector.broadcast %77 : vector<1x64xf32> to vector<2x64xf32>
    %79 = arith.addf %76, %78 : vector<2x64xf32>
    %c0_50 = arith.constant 0 : index
    %c0_51 = arith.constant 0 : index
    %80 = vector.load %arg5[%c0_50, %c0_51] : memref<1x64xf32, #tpu.memory_space<vmem>>, vector<1x64xf32>
    %81 = vector.broadcast %80 : vector<1x64xf32> to vector<2x64xf32>
    %82 = arith.mulf %79, %81 : vector<2x64xf32>
    %cst_52 = arith.constant dense<0.000000e+00> : vector<2xf32>
    %83 = vector.multi_reduction <add>, %82, %cst_52 [1] : vector<2x64xf32> to vector<2xf32>
    %84 = vector.shape_cast %83 : vector<2xf32> to vector<2x1xf32>
    %c0_53 = arith.constant 0 : index
    %c0_54 = arith.constant 0 : index
    %85 = vector.load %arg6[%c0_53, %c0_54] : memref<1x1xf32, #tpu.memory_space<vmem>>, vector<1x1xf32>
    %86 = vector.broadcast %85 : vector<1x1xf32> to vector<2x1xf32>
    %87 = arith.addf %84, %86 : vector<2x1xf32>
    %88 = arith.negf %87 : vector<2x1xf32>
    %89 = math.exp %88 : vector<2x1xf32>
    %cst_55 = arith.constant 1.000000e+00 : f32
    %90 = vector.broadcast %cst_55 : f32 to vector<2x1xf32>
    %91 = arith.addf %90, %89 : vector<2x1xf32>
    %92 = arith.divf %90, %91 : vector<2x1xf32>
    %c0_56 = arith.constant 0 : index
    %c0_57 = arith.constant 0 : index
    %93 = vector.load %arg7[%c0_56, %c0_57] : memref<2x1xf32, #tpu.memory_space<vmem>>, vector<2x1xf32>
    tpu.vector_store %arg7[%c0_56, %c0_57], %92 {strides = array<i32>} : memref<2x1xf32, #tpu.memory_space<vmem>>, vector<2x1xf32>,
    return
  }
}

</mosaic_0001>

<bundles_post_ra>
// kernel: discriminator_forward.5
= control target key start
LH: loop header
LB: loop body
LE: loop exit
PB: predicated region body
PF: predicated region fallthrough
CT: control target
= control target key end

     0   :  { %s1340_s15 = smov 0   ;;  %s1590_s0 = inlined_call_operand.vmem [shape: bf16[2,33,396], index: 0, kind: input, shape index: {}]   ;;  %s1591_s1 = inlined_call_operand.vmem [shape: bf16[396,128], index: 1, kind: input, shape index: {}]   ;;  %s1592_s2 = inlined_call_operand.vmem [shape: bf16[396,128], index: 2, kind: input, shape index: {}]   ;;  %s1593_s3 = inlined_call_operand.vmem [shape: bf16[2,32,128], index: 3, kind: output, shape index: {0}]   ;;  %s1594_s4 = inlined_call_operand.vmem [shape: f32[2,128], index: 4, kind: output, shape index: {1}]  }
   0x1 LB: > { %s977_s16 = sadd.s32 4294967295, %s1312_s15   ;;  %p981_p0 = scmp.ge.s32.totalorder %s1312_s15, 1  ;;  %s1312_s15 = sphi %s1340_s15, %s15_s15  }
   0x2   : > { %p160_p1 = scmp.lt.s32.totalorder %s1312_s15, 3 }
   0x4   : > { %p161_p2 = pnand %p981_p0, %p160_p1 }
   0x5   : > { %p186_p3 = scmp.lt.s32.totalorder (!%p161_p2), %s977_s16, 1  ;;  %p985_p4 = scmp.ne.s32.totalorder (!%p161_p2), %s977_s16, 0 }
   0x6   : > { %164 = sbr.rel (%p161_p2) target bundleno = 292 (0x124), region = 32 }
   0xb   : > { %s187_s17 = scalar_select %p186_p3, %s977_s16, 1 }
   0xc   : > { %200 = sbr.rel (%p985_p4) target bundleno = 19 (0x13), region = 36 }
   0xd   : > { %s1296_s18 = smul.u32 80, %s187_s17  ;;  %s1226_s19 = sshll.u32 %s187_s17, 4 }
   0xe   : > { %s1351_s22 = scalar_lea.vmem %s1593_s3, %s1226_s19 }
   0xf   : > { %s1356_s25 = scalar_lea.vmem %s1590_s0, %s1296_s18 }
  0x11   : > { %v1314_v0 = vmov 0.0  }
  0x12   : > { %201 = vst [vmem:[%s1594_s4] sm:$0x3] %v1314_v0 }
  0x13 PF: > { %v1242_v1 = vld [vmem:[%s1591_s1 + $0x38] sm:$0xff]  ;;  %v1241_v4 = vld [vmem:[%s1591_s1 + $0x30] sm:$0xff]  ;;  %vm472_vm0 = vcmask 1045504   ;;  %v1116_v7 = vld [vmem:[%s1591_s1 + $0xc0] sm:$0xf]  ;;  %vm462_vm1 = vcmask 97280  }
  0x14   : > { %v1250_v2 = vld [vmem:[%s1591_s1 + $0x78] sm:$0xff]  ;;  %476 = vmatpush.bf16.msra.mxu0 %v1242_v1  ;;  %v1249_v5 = vld [vmem:[%s1591_s1 + $0x70] sm:$0xff]  ;;  %v1259_v8 = vld [vmem:[%s1591_s1 + $0xc0] sm:$0x30]  ;;  %vm863_vm2 = vcmask 1046528   ;;  %vm912_vm3 = vcmask 1040384  }
  0x15   : > { %v1258_v3 = vld [vmem:[%s1591_s1 + $0xb8] sm:$0xff]  ;;  %498 = vmatpush.bf16.msra.mxu1 %v1250_v2  ;;  %v1257_v6 = vld [vmem:[%s1591_s1 + $0xb0] sm:$0xff]  ;;  %v1228_v9 = vld [vmem:[%s1356_s25 + $0xc] sm:$0xf]  ;;  %v1117_v12 = vor.u32 %v1259_v8, %v1116_v7 }
  0x16   : > { %520 = vmatpush.bf16.msra.mxu2 %v1258_v3  ;;  %v1240_v10 = vld [vmem:[%s1591_s1 + $0x28] sm:$0xff]  ;;  %v998_v13 = vld [vmem:[%s1356_s25 + $0x18] sm:$0xf0]  ;;  %v1239_v18 = vld [vmem:[%s1591_s1 + $0x20] sm:$0xff] }
  0x17   : > { %v1248_v11 = vld [vmem:[%s1591_s1 + $0x68] sm:$0xff]  ;;  %v474_v15 = vsel %vm472_vm0, %v1117_v12, 0  ;;  %v1397_v16 = vor.u32 %v1228_v9, %v998_v13  ;;  %v1267_v17 = vld [vmem:[%s1592_s2 + $0x38] sm:$0xff]  ;;  %v1247_v19 = vld [vmem:[%s1591_s1 + $0x60] sm:$0xff] }
  0x18   : > { %477 = vmatpush.bf16.msra.mxu0 %v1241_v4  ;;  %v1256_v14 = vld [vmem:[%s1591_s1 + $0xa8] sm:$0xff]  ;;  %549 = vmatpush.bf16.msra.mxu3 %v474_v15  ;;  %v1255_v20 = vld [vmem:[%s1591_s1 + $0xa0] sm:$0xff]  ;;  %v1266_v21 = vld [vmem:[%s1592_s2 + $0x30] sm:$0xff] }
  0x19   : > { %499 = vmatpush.bf16.msra.mxu1 %v1249_v5  ;;  %v1238_v22 = vld [vmem:[%s1591_s1 + $0x18] sm:$0xff]  ;;  %v1265_v25 = vld [vmem:[%s1592_s2 + $0x28] sm:$0xff]  ;;  %v1237_v26 = vld [vmem:[%s1591_s1 + $0x10] sm:$0xff] }
  0x1a   : > { %521 = vmatpush.bf16.msra.mxu2 %v1257_v6  ;;  %v1246_v23 = vld [vmem:[%s1591_s1 + $0x58] sm:$0xff]  ;;  %v1245_v27 = vld [vmem:[%s1591_s1 + $0x50] sm:$0xff]  ;;  %v1264_v29 = vld [vmem:[%s1592_s2 + $0x20] sm:$0xff] }
  0x1b   : > { %1118 = vmatmul.msk.bf16.vlgmr.msra.gmra.mxu3 %vm462_vm1, %v1397_v16  ;;  %v1254_v24 = vld [vmem:[%s1591_s1 + $0x98] sm:$0xff]  ;;  %v1253_v28 = vld [vmem:[%s1591_s1 + $0x90] sm:$0xff]  ;;  %v1236_v30 = vld [vmem:[%s1591_s1 + $0x8] sm:$0xff] }
  0x1c   : > { %478 = vmatpush.bf16.msra.mxu0 %v1240_v10  ;;  %766 = vmatpush.bf16.msrb.mxu3 %v1267_v17  ;;  %v1232_v31 = vld [vmem:[%s1356_s25 + $0x2c] sm:$0xf]  ;;  %v1014_v32 = vld [vmem:[%s1356_s25 + $0x38] sm:$0xf0]  ;;  %v1219_v34 = vld [vmem:[%s1592_s2 + $0xc0] sm:$0xf] }
  0x1d   : > { %500 = vmatpush.bf16.msra.mxu1 %v1248_v11  ;;  %v1244_v33 = vld [vmem:[%s1591_s1 + $0x48] sm:$0xff]  ;;  %v1284_v35 = vld [vmem:[%s1592_s2 + $0xc0] sm:$0x30]  ;;  %v1263_v37 = vld [vmem:[%s1592_s2 + $0x18] sm:$0xff]  ;;  %v1463_v39 = vor.u32 %v1232_v31, %v1014_v32 }
  0x1e   : > { %522 = vmatpush.bf16.msra.mxu2 %v1256_v14  ;;  %v1252_v36 = vld [vmem:[%s1591_s1 + $0x88] sm:$0xff]  ;;  %v1235_v38 = vld [vmem:[%s1591_s1] sm:$0xff]  ;;  %v1220_v43 = vor.u32 %v1284_v35, %v1219_v34  ;;  %v1229_v44 = vld [vmem:[%s1356_s25 + $0xc] sm:$0xf0] }
  0x1f   : > { %v1243_v40 = vld [vmem:[%s1591_s1 + $0x40] sm:$0xff]  ;;  %v990_v46 = vld [vmem:[%s1356_s25 + $0x10] sm:$0xf0]  ;;  %v996_v47 = vld [vmem:[%s1356_s25 + $0x8] sm:$0xf] }
  0x20   : > { %479 = vmatpush.bf16.msra.mxu0 %v1239_v18  ;;  %767 = vmatpush.bf16.msrb.mxu3 %v1266_v21  ;;  %v1251_v41 = vld [vmem:[%s1591_s1 + $0x80] sm:$0xff]  ;;  %v1230_v48 = vld [vmem:[%s1356_s25 + $0x14] sm:$0xf0]  ;;  %v764_v53 = vsel %vm472_vm0, %v1220_v43, 0  ;;  %v1262_v55 = vld [vmem:[%s1592_s2 + $0x10] sm:$0xff] }
  0x21   : > { %501 = vmatpush.bf16.msra.mxu1 %v1247_v19  ;;  %v988_v42 = vld [vmem:[%s1356_s25] sm:$0xf]  ;;  %v1227_v45 = vld [vmem:[%s1356_s25 + $0x4] sm:$0xf]  ;;  %v1275_v49 = vld [vmem:[%s1592_s2 + $0x78] sm:$0xff]  ;;  %v1490_v54 = vor.u32 %v1230_v48, %v996_v47 }
  0x22   : > { %523 = vmatpush.bf16.msra.mxu2 %v1255_v20  ;;  %v1283_v50 = vld [vmem:[%s1592_s2 + $0xb8] sm:$0xff]  ;;  %v1485_v51 = vor.u32 %v1229_v44, %v988_v42  ;;  %v1487_v52 = vor.u32 %v1227_v45, %v990_v46  ;;  %v1274_v56 = vld [vmem:[%s1592_s2 + $0x70] sm:$0xff]  ;;  %v211_v58 = vld [vmem:[%s1356_s25 + $0x48] sm:$0x11] }
  0x23   : > { %v1282_v57 = vld [vmem:[%s1592_s2 + $0xb0] sm:$0xff]  ;;  %v1261_v59 = vld [vmem:[%s1592_s2 + $0x8] sm:$0xff]  ;;  %v291_v62 = vunpack.c.h.b16 %v211_v58  ;;  %v1260_v63 = vld [vmem:[%s1592_s2] sm:$0xff] }
  0x24   : > { %480 = vmatpush.bf16.msra.mxu0 %v1238_v22  ;;  %768 = vmatpush.bf16.msrb.mxu3 %v1265_v25  ;;  %v1273_v60 = vld [vmem:[%s1592_s2 + $0x68] sm:$0xff]  ;;  %v1272_v0 = vld [vmem:[%s1592_s2 + $0x60] sm:$0xff]  ;;  %v1233_v4 = vld [vmem:[%s1356_s25 + $0x2c] sm:$0xf0] }
  0x25   : > { %502 = vmatpush.bf16.msra.mxu1 %v1246_v23  ;;  %v1281_v61 = vld [vmem:[%s1592_s2 + $0xa8] sm:$0xff]  ;;  %v303_v1 = vpack.c.b16 %v291_v62, %v291_v62  ;;  %v1280_v2 = vld [vmem:[%s1592_s2 + $0xa0] sm:$0xff]  ;;  %v1006_v6 = vld [vmem:[%s1356_s25 + $0x30] sm:$0xf0] }
  0x26   : > { %524 = vmatpush.bf16.msra.mxu2 %v1254_v24  ;;  %v1004_v3 = vld [vmem:[%s1356_s25 + $0x20] sm:$0xf]  ;;  %v1231_v5 = vld [vmem:[%s1356_s25 + $0x24] sm:$0xf]  ;;  %v1012_v7 = vld [vmem:[%s1356_s25 + $0x28] sm:$0xf]  ;;  %v290_v24 = vunpack.c.l.b16 %v211_v58 }
  0x27   : > { %v1234_v8 = vld [vmem:[%s1356_s25 + $0x34] sm:$0xf0]  ;;  %v1005_v11 = vor.u32 %v1233_v4, %v1004_v3  ;;  %v1009_v12 = vor.u32 %v1231_v5, %v1006_v6  ;;  %v1270_v14 = vld [vmem:[%s1592_s2 + $0x50] sm:$0xff]  ;;  %v1269_v17 = vld [vmem:[%s1592_s2 + $0x48] sm:$0xff] }
  0x28   : > { %481 = vmatpush.bf16.msra.mxu0 %v1237_v26  ;;  %769 = vmatpush.bf16.msrb.mxu3 %v1264_v29  ;;  %v1271_v9 = vld [vmem:[%s1592_s2 + $0x58] sm:$0xff]  ;;  %v1013_v13 = vor.u32 %v1234_v8, %v1012_v7  ;;  %v1278_v15 = vld [vmem:[%s1592_s2 + $0x90] sm:$0xff]  ;;  %v1277_v18 = vld [vmem:[%s1592_s2 + $0x88] sm:$0xff] }
  0x29   : > { %503 = vmatpush.bf16.msra.mxu1 %v1245_v27  ;;  %v1279_v10 = vld [vmem:[%s1592_s2 + $0x98] sm:$0xff]  ;;  %v210_v19 = vld [vmem:[%s1356_s25 + $0x40] sm:$0x11]  ;;  %v302_v27 = vpack.c.b16 %v290_v24, %v290_v24 }
  0x2a   : > { %525 = vmatpush.bf16.msra.mxu2 %v1253_v28  ;;  %v1268_v20 = vld [vmem:[%s1592_s2 + $0x40] sm:$0xff]  ;;  %v288_v22 = vunpack.c.l.b16 %v210_v19  ;;  %v289_v23 = vunpack.c.h.b16 %v210_v19 }
  0x2b   : > { %1119 = vmatmul.msk.bf16.gmra.mxu3 %vm462_vm1, %v1463_v39  ;;  %v1276_v21 = vld [vmem:[%s1592_s2 + $0x80] sm:$0xff] }
  0x2c   : > { %482 = vmatpush.bf16.msra.mxu0 %v1236_v30  ;;  %770 = vmatpush.bf16.msrb.mxu3 %v1263_v37  ;;  %v300_v25 = vpack.c.b16 %v288_v22, %v288_v22  ;;  %v301_v26 = vpack.c.b16 %v289_v23, %v289_v23 }
  0x2d   : > { %504 = vmatpush.bf16.msra.mxu1 %v1244_v33 }
  0x2e   : > { %526 = vmatpush.bf16.msra.mxu2 %v1252_v36 }
  0x30   : > { %483 = vmatpush.bf16.msra.mxu0 %v1235_v38  ;;  %771 = vmatpush.bf16.msrb.mxu3 %v1262_v55 }
  0x31   : > { %505 = vmatpush.bf16.msra.mxu1 %v1243_v40 }
  0x32   : > { %527 = vmatpush.bf16.msra.mxu2 %v1251_v41 }
  0x33   : > { %484 = vmatmul.bf16.vlgmr.msra.gmra.mxu0 %v1485_v51 }
  0x34   : > { %789 = vmatpush.bf16.msrb.mxu0 %v1275_v49  ;;  %506 = vmatmul.bf16.vlgmr.msra.gmra.mxu1 %v1487_v52 }
  0x35   : > { %812 = vmatpush.bf16.msrb.mxu1 %v1283_v50  ;;  %528 = vmatmul.bf16.vlgmr.msra.gmra.mxu2 %v1490_v54 }
  0x36   : > { %842 = vmatpush.bf16.msrb.mxu2 %v764_v53  ;;  %772 = vmatpush.bf16.msrb.mxu3 %v1261_v59 }
  0x38   : > { %790 = vmatpush.bf16.msrb.mxu0 %v1274_v56 }
  0x39   : > { %813 = vmatpush.bf16.msrb.mxu1 %v1282_v57 }
  0x3a   : > { %773 = vmatpush.bf16.msrb.mxu3 %v1260_v63 }
  0x3b   : > { %1120 = vmatmul.msk.bf16.gmra.mxu3 %vm462_vm1, %v303_v1 }
  0x3c   : > { %791 = vmatpush.bf16.msrb.mxu0 %v1273_v60 }
  0x3d   : > { %814 = vmatpush.bf16.msrb.mxu1 %v1281_v61 }
  0x40   : > { %792 = vmatpush.bf16.msrb.mxu0 %v1272_v0 }
  0x41   : > { %815 = vmatpush.bf16.msrb.mxu1 %v1280_v2 }
  0x43   : > { %489 = vmatmul.bf16.gmra.mxu0 %v1005_v11 }
  0x44   : > { %793 = vmatpush.bf16.msrb.mxu0 %v1271_v9  ;;  %511 = vmatmul.bf16.gmra.mxu1 %v1009_v12 }
  0x45   : > { %816 = vmatpush.bf16.msrb.mxu1 %v1279_v10  ;;  %533 = vmatmul.bf16.gmra.mxu2 %v1013_v13 }
  0x48   : > { %794 = vmatpush.bf16.msrb.mxu0 %v1270_v14 }
  0x49   : > { %817 = vmatpush.bf16.msrb.mxu1 %v1278_v15 }
  0x4b   : > { %774 = vmatmul.bf16.vlgmr.msrb.gmra.mxu3 %v1485_v51 }
  0x4c   : > { %795 = vmatpush.bf16.msrb.mxu0 %v1269_v17 }
  0x4d   : > { %818 = vmatpush.bf16.msrb.mxu1 %v1277_v18 }
  0x50   : > { %796 = vmatpush.bf16.msrb.mxu0 %v1268_v20 }
  0x51   : > { %819 = vmatpush.bf16.msrb.mxu1 %v1276_v21 }
  0x53   : > { %494 = vmatmul.bf16.gmra.mxu0 %v300_v25 }
  0x54   : > { %516 = vmatmul.bf16.gmra.mxu1 %v301_v26 }
  0x55   : > { %538 = vmatmul.bf16.gmra.mxu2 %v302_v27 }
  0x5b   : > { %779 = vmatmul.bf16.gmra.mxu3 %v1005_v11 }
  0x63   : > { %797 = vmatmul.bf16.vlgmr.msrb.gmra.mxu0 %v1487_v52 }
  0x64   : > { %820 = vmatmul.bf16.vlgmr.msrb.gmra.mxu1 %v1490_v54 }
  0x65   : > { %1221 = vmatmul.msk.bf16.vlgmr.msrb.gmra.mxu2 %vm462_vm1, %v1397_v16 }
  0x6b   : > { %784 = vmatmul.bf16.gmra.mxu3 %v300_v25 }
  0x73   : > { %802 = vmatmul.bf16.gmra.mxu0 %v1009_v12 }
  0x74   : > { %825 = vmatmul.bf16.gmra.mxu1 %v1013_v13 }
  0x75   : > { %1222 = vmatmul.msk.bf16.gmra.mxu2 %vm462_vm1, %v1463_v39 }
  0x83   : > { %807 = vmatmul.bf16.gmra.mxu0 %v301_v26 }
  0x84   : > { %830 = vmatmul.bf16.gmra.mxu1 %v302_v27 }
  0x85   : > { %1223 = vmatmul.msk.bf16.gmra.mxu2 %vm462_vm1, %v303_v1 }
  0x9e   : > { %v551_v28 = vpop.f32.mrf.mxu3 }
  0xa6   : > { %v1563_v29 = vpop.f32.mrf.mxu3 }
  0xae   : > { %v556_v33 = vpop.f32.mrf.mxu3 }
  0xb0   : > { %v485_v30 = vpop.f32.mrf.mxu0 }
  0xb1   : > { %v507_v31 = vpop.f32.mrf.mxu1 }
  0xb2   : > { %v508_v32 = vadd.f32 %v507_v31, %v485_v30 }
  0xb6   : > { %v1565_v37 = vpop.f32.mrf.mxu3 }
  0xb8   : > { %v529_v34 = vpop.f32.mrf.mxu2  ;;  %v487_v16 = vpop.f32.mrf.mxu0 }
  0xb9   : > { %v530_v35 = vadd.f32 %v529_v34, %v508_v32  ;;  %v509_v36 = vpop.f32.mrf.mxu1 }
  0xba   : > { %v510_v15 = vadd.f32 %v509_v36, %v487_v16 }
  0xbb   : > { %v552_v38 = vadd.f32 %v551_v28, %v530_v35 }
  0xbe   : > { %v561_v43 = vpop.f32.mrf.mxu3 }
  0xc0   : > { %v531_v40 = vpop.f32.mrf.mxu2  ;;  %v490_v39 = vpop.f32.mrf.mxu0 }
  0xc1   : > { %v512_v41 = vpop.f32.mrf.mxu1  ;;  %v532_v18 = vadd.f32 %v531_v40, %v510_v15 }
  0xc2   : > { %v513_v42 = vadd.f32 %v512_v41, %v490_v39 }
  0xc3   : > { %v554_v27 = vadd.f32 %v1563_v29, %v532_v18 }
  0xc6   : > { %v562_v48 = vpop.f32.mrf.mxu3 }
  0xc8   : > { %v534_v44 = vpop.f32.mrf.mxu2  ;;  %v1567_v46 = vpop.f32.mrf.mxu0 }
  0xc9   : > { %v535_v45 = vadd.f32 %v534_v44, %v513_v42  ;;  %v1569_v47 = vpop.f32.mrf.mxu1 }
  0xcb   : > { %v557_v49 = vadd.f32 %v556_v33, %v535_v45 }
  0xce   : > { %v775_v53 = vpop.f32.mrf.mxu3 }
  0xd0   : > { %v536_v50 = vpop.f32.mrf.mxu2  ;;  %v495_v51 = vpop.f32.mrf.mxu0 }
  0xd1   : > { %v517_v52 = vpop.f32.mrf.mxu1 }
  0xd6   : > { %v777_v57 = vpop.f32.mrf.mxu3 }
  0xd8   : > { %v539_v54 = vpop.f32.mrf.mxu2  ;;  %v496_v55 = vpop.f32.mrf.mxu0 }
  0xd9   : > { %v518_v56 = vpop.f32.mrf.mxu1 }
  0xde   : > { %v780_v61 = vpop.f32.mrf.mxu3 }
  0xe0   : > { %v540_v58 = vpop.f32.mrf.mxu2  ;;  %v798_v59 = vpop.f32.mrf.mxu0 }
  0xe1   : > { %v821_v60 = vpop.f32.mrf.mxu1  ;;  %v799_v2 = vadd.f32 %v798_v59, %v775_v53 }
  0xe3   : > { %v822_v4 = vadd.f32 %v821_v60, %v799_v2 }
  0xe6   : > { %v782_v1 = vpop.f32.mrf.mxu3 }
  0xe8   : > { %v844_v62 = vpop.f32.mrf.mxu2  ;;  %v800_v63 = vpop.f32.mrf.mxu0 }
  0xe9   : > { %v823_v0 = vpop.f32.mrf.mxu1  ;;  %v801_v3 = vadd.f32 %v800_v63, %v777_v57  ;;  %v845_v12 = vadd.f32 %v844_v62, %v822_v4 }
  0xeb   : > { %v824_v5 = vadd.f32 %v823_v0, %v801_v3  ;;  %v864_v17 = vrot.slane %v845_v12, 1 }
  0xee   : > { %v785_v11 = vpop.f32.mrf.mxu3 }
  0xf0   : > { %v846_v6 = vpop.f32.mrf.mxu2  ;;  %v803_v8 = vpop.f32.mrf.mxu0 }
  0xf1   : > { %v847_v7 = vadd.f32 %v846_v6, %v824_v5  ;;  %v826_v9 = vpop.f32.mrf.mxu1  ;;  %v804_v10 = vadd.f32 %v803_v8, %v780_v61 }
  0xf3   : > { %v865_v13 = vrot.slane %v847_v7, 1  ;;  %v827_v14 = vadd.f32 %v826_v9, %v804_v10 }
  0xf5   : > { %v866_v20 = vsel %vm863_vm2, %v864_v17, %v865_v13 }
  0xf6   : > { %v787_v24 = vpop.f32.mrf.mxu3  ;;  %v877_v28 = vadd.f32 %v866_v20, %v552_v38  ;;  %v515_v38 = vadd.f32 %v1569_v47, %v1567_v46 }
  0xf8   : > { %v849_v19 = vpop.f32.mrf.mxu2  ;;  %v805_v22 = vpop.f32.mrf.mxu0  ;;  %v898_v33 = vmul.f32 %v877_v28, %v877_v28  ;;  %v537_v51 = vadd.f32 %v536_v50, %v515_v38 }
  0xf9   : > { %v850_v21 = vadd.f32 %v849_v19, %v827_v14  ;;  %v828_v23 = vpop.f32.mrf.mxu1  ;;  %v806_v26 = vadd.f32 %v805_v22, %v782_v1 }
  0xfa   : > { %v559_v60 = vadd.f32 %v1565_v37, %v537_v51 }
  0xfb   : > { %v867_v25 = vrot.slane %v850_v21, 1  ;;  %v829_v32 = vadd.f32 %v828_v23, %v806_v26 }
  0xfd   : > { %v868_v30 = vsel %vm863_vm2, %v865_v13, %v867_v25 }
  0xfe   : > { %v878_v31 = vadd.f32 %v868_v30, %v554_v27 }
 0x100   : > { %v1288_v34 = vpack.c.bf16 %v878_v31, %v877_v28  ;;  %v889_v35 = vadd.f32 %v878_v31, %v877_v28  ;;  %v899_v16 = vmul.f32 %v878_v31, %v878_v31  ;;  %v851_v36 = vpop.f32.mrf.mxu2  ;;  %v808_v39 = vpop.f32.mrf.mxu0 }
 0x101   : > { %v852_v40 = vadd.f32 %v851_v36, %v829_v32  ;;  %v831_v41 = vpop.f32.mrf.mxu1  ;;  %v809_v43 = vadd.f32 %v808_v39, %v785_v11  ;;  %v911_v11 = vld [vmem:[%s1594_s4] sm:$0x3] }
 0x102   : > { %1289 = vst [vmem:[%s1351_s22] sm:$0xff] %v1288_v34   ;;  %v902_v42 = vadd.f32 %v899_v16, %v898_v33 }
 0x103   : > { %v869_v44 = vrot.slane %v852_v40, 1  ;;  %v832_v29 = vadd.f32 %v831_v41, %v809_v43 }
 0x105   : > { %v870_v45 = vsel %vm863_vm2, %v867_v25, %v869_v44 }
 0x106   : > { %v879_v48 = vadd.f32 %v870_v45, %v557_v49 }
 0x108   : > { %v890_v52 = vadd.f32 %v889_v35, %v879_v48  ;;  %v900_v53 = vmul.f32 %v879_v48, %v879_v48  ;;  %v854_v54 = vpop.f32.mrf.mxu2  ;;  %v810_v56 = vpop.f32.mrf.mxu0 }
 0x109   : > { %v855_v55 = vadd.f32 %v854_v54, %v832_v29  ;;  %v833_v57 = vpop.f32.mrf.mxu1 }
 0x10a   : > { %v903_v58 = vadd.f32 %v902_v42, %v900_v53 }
 0x10b   : > { %v871_v59 = vrot.slane %v855_v55, 1 }
 0x10d   : > { %v872_v61 = vsel %vm863_vm2, %v869_v44, %v871_v59 }
 0x10e   : > { %v880_v62 = vadd.f32 %v872_v61, %v559_v60 }
 0x110   : > { %v1293_v63 = vpack.c.bf16 %v880_v62, %v879_v48  ;;  %v891_v0 = vadd.f32 %v890_v52, %v880_v62  ;;  %v901_v1 = vmul.f32 %v880_v62, %v880_v62  ;;  %v856_v46 = vpop.f32.mrf.mxu2 }
 0x112   : > { %1295 = vst [vmem:[%s1351_s22 + $0x8] sm:$0xff] %v1293_v63   ;;  %v892_v47 = vrot.slane %v891_v0, 4  ;;  %v904_v49 = vadd.f32 %v903_v58, %v901_v1 }
 0x114   : > { %v893_v50 = vadd.f32 %v892_v47, %v891_v0  ;;  %v905_v2 = vrot.slane %v904_v49, 4 }
 0x116   : > { %v894_v3 = vrot.slane %v893_v50, 2  ;;  %v906_v4 = vadd.f32 %v905_v2, %v904_v49 }
 0x118   : > { %v895_v5 = vadd.f32 %v894_v3, %v893_v50  ;;  %v907_v6 = vrot.slane %v906_v4, 2 }
 0x11a   : > { %v896_v7 = vrot.slane %v895_v5, 1  ;;  %v908_v8 = vadd.f32 %v907_v6, %v906_v4 }
 0x11c   : > { %v909_v9 = vrot.slane %v908_v8, 1  ;;  %v897_v37 = vadd.f32 %v896_v7, %v895_v5 }
 0x11e   : > { %v910_v10 = vadd.f32 %v909_v9, %v908_v8 }
 0x120   : > { %v913_v12 = vsel %vm912_vm3, %v897_v37, %v910_v10 }
 0x121   : > { %v914_v13 = vadd.f32 %v913_v12, %v911_v11 }
 0x123   : > { %915 = vst [vmem:[%s1594_s4] sm:$0x3] %v914_v13 }
 0x124 PF: > { %s15_s15 = sadd.s32 1, %s1312_s15  }
 0x125   : > { %p12_p5 = scmp.ge.s32.totalorder %s15_s15, 4  }
 0x127   :  { %14 = sbr.rel (!%p12_p5) target bundleno = 1 (0x1), region = 74 }

// kernel: discriminator_forward.6
= control target key start
LH: loop header
LB: loop body
LE: loop exit
PB: predicated region body
PF: predicated region fallthrough
CT: control target
= control target key end

     0   :  { %s1069_s21 = smov 0   ;;  %s1271_s0 = inlined_call_operand.vmem [shape: bf16[2,17,272], index: 0, kind: input, shape index: {}]   ;;  %s1272_s1 = inlined_call_operand.vmem [shape: f32[17,272], index: 1, kind: input, shape index: {}]   ;;  %s1273_s2 = inlined_call_operand.vmem [shape: f32[17,272], index: 2, kind: input, shape index: {}]   ;;  %s1274_s3 = inlined_call_operand.vmem [shape: bf16[272,128], index: 3, kind: input, shape index: {}]   ;;  %s1275_s4 = inlined_call_operand.vmem [shape: bf16[272,128], index: 4, kind: input, shape index: {}]   ;;  %s1276_s5 = inlined_call_operand.vmem [shape: bf16[2,16,128], index: 5, kind: output, shape index: {0}]   ;;  %s1277_s6 = inlined_call_operand.vmem [shape: f32[2,128], index: 6, kind: output, shape index: {1}]  }
   0x1 LB: > { %s823_s22 = sadd.s32 4294967295, %s1031_s21   ;;  %p827_p0 = scmp.ge.s32.totalorder %s1031_s21, 1  ;;  %s1031_s21 = sphi %s1069_s21, %s17_s21  }
   0x2   : > { %p210_p1 = scmp.lt.s32.totalorder %s1031_s21, 3 }
   0x4   : > { %p211_p2 = pnand %p827_p0, %p210_p1 }
   0x5   : > { %p240_p3 = scmp.lt.s32.totalorder (!%p211_p2), %s823_s22, 1  ;;  %p831_p4 = scmp.ne.s32.totalorder (!%p211_p2), %s823_s22, 0 }
   0x6   : > { %214 = sbr.rel (%p211_p2) target bundleno = 244 (0xf4), region = 40 }
   0xb   : > { %s241_s23 = scalar_select %p240_p3, %s823_s22, 1 }
   0xc   : > { %254 = sbr.rel (%p831_p4) target bundleno = 19 (0x13), region = 44 }
   0xd   : > { %s1015_s24 = smul.u32 36, %s241_s23  ;;  %s974_s25 = sshll.u32 %s241_s23, 3 }
   0xe   : > { %s1080_s28 = scalar_lea.vmem %s1276_s5, %s974_s25 }
   0xf   : > { %s1085_s7 = scalar_lea.vmem %s1271_s0, %s1015_s24 }
  0x11   : > { %v1033_v0 = vmov 0.0  }
  0x12   : > { %255 = vst [vmem:[%s1277_s6] sm:$0x3] %v1033_v0 }
  0x13 PF: > { %v982_v1 = vld [vmem:[%s1274_s3 + $0x38] sm:$0xff]  ;;  %v981_v3 = vld [vmem:[%s1274_s3 + $0x30] sm:$0xff]  ;;  %v991_v4 = vld [vmem:[%s1274_s3 + $0x80] sm:$0xff]  ;;  %vm476_vm2 = vcmask 130048   ;;  %vm727_vm10 = vcmask 1046528   ;;  %vm758_vm11 = vcmask 1040384  }
  0x14   : > { %v990_v2 = vld [vmem:[%s1274_s3 + $0x78] sm:$0xff]  ;;  %483 = vmatpush.bf16.msra.mxu0 %v982_v1  ;;  %v989_v5 = vld [vmem:[%s1274_s3 + $0x70] sm:$0xff]  ;;  %v257_v7 = vld [vmem:[%s1085_s7 + $0x8] sm:$0xf]  ;;  %524 = vmatpush.bf16.msra.mxu2 %v991_v4 }
  0x15   : > { %500 = vmatpush.bf16.msra.mxu1 %v990_v2  ;;  %v999_v6 = vld [vmem:[%s1275_s4 + $0x38] sm:$0xff]  ;;  %v259_v8 = vld [vmem:[%s1085_s7 + $0x14] sm:$0xf]  ;;  %v264_v9 = vunpack.c.l.bf16 %v257_v7  ;;  %v276_v11 = vld [vmem:[%s1272_s1 + $0x28] sm:$0xff] }
  0x16   : > { %v273_v10 = vld [vmem:[%s1272_s1 + $0x10] sm:$0xff]  ;;  %670 = vmatpush.bf16.msra.mxu3 %v999_v6  ;;  %v267_v12 = vunpack.c.l.bf16 %v259_v8  ;;  %v1007_v14 = vld [vmem:[%s1275_s4 + $0x78] sm:$0xff]  ;;  %v294_v16 = vld [vmem:[%s1273_s2 + $0x28] sm:$0xff] }
  0x17   : > { %v291_v13 = vld [vmem:[%s1273_s2 + $0x10] sm:$0xff]  ;;  %v282_v15 = vmul.f32 %v273_v10, %v264_v9  ;;  %v980_v18 = vld [vmem:[%s1274_s3 + $0x28] sm:$0xff]  ;;  %v979_v26 = vld [vmem:[%s1274_s3 + $0x20] sm:$0xff] }
  0x18   : > { %v998_v17 = vld [vmem:[%s1275_s4 + $0x30] sm:$0xff]  ;;  %484 = vmatpush.bf16.msra.mxu0 %v981_v3  ;;  %v988_v19 = vld [vmem:[%s1274_s3 + $0x68] sm:$0xff]  ;;  %v285_v20 = vmul.f32 %v276_v11, %v267_v12  ;;  %688 = vmatpush.bf16.msrb.mxu2 %v1007_v14  ;;  %v987_v28 = vld [vmem:[%s1274_s3 + $0x60] sm:$0xff] }
  0x19   : > { %501 = vmatpush.bf16.msra.mxu1 %v989_v5  ;;  %v300_v21 = vadd.f32 %v291_v13, %v282_v15  ;;  %v1006_v22 = vld [vmem:[%s1275_s4 + $0x70] sm:$0xff]  ;;  %v997_v24 = vld [vmem:[%s1275_s4 + $0x28] sm:$0xff]  ;;  %v261_v29 = vld [vmem:[%s1085_s7 + $0x20] sm:$0x1] }
  0x1a   : > { %v303_v23 = vadd.f32 %v294_v16, %v285_v20  ;;  %671 = vmatpush.bf16.msra.mxu3 %v998_v17  ;;  %v270_v31 = vunpack.c.l.bf16 %v261_v29  ;;  %v279_v32 = vld [vmem:[%s1272_s1 + $0x40] sm:$0x1]  ;;  %v978_v34 = vld [vmem:[%s1274_s3 + $0x18] sm:$0xff]  ;;  %v1005_v36 = vld [vmem:[%s1275_s4 + $0x68] sm:$0xff] }
  0x1b   : > { %vm309_vm0 = vcmp.ge.f32.partialorder %v300_v21, 0.0  ;;  %v318_v25 = vmul.f32 0.2, %v300_v21  ;;  %v986_v35 = vld [vmem:[%s1274_s3 + $0x58] sm:$0xff]  ;;  %v996_v37 = vld [vmem:[%s1275_s4 + $0x20] sm:$0xff]  ;;  %v258_v42 = vld [vmem:[%s1085_s7 + $0xc] sm:$0xff] }
  0x1c   : > { %485 = vmatpush.bf16.msra.mxu0 %v980_v18  ;;  %vm312_vm1 = vcmp.ge.f32.partialorder %v303_v23, 0.0  ;;  %v321_v27 = vmul.f32 0.2, %v303_v23  ;;  %689 = vmatpush.bf16.msrb.mxu2 %v1006_v22  ;;  %v297_v38 = vld [vmem:[%s1273_s2 + $0x40] sm:$0x1]  ;;  %v288_v40 = vmul.f32 %v279_v32, %v270_v31  ;;  %v265_v45 = vunpack.c.l.bf16 %v258_v42  ;;  %v274_v46 = vld [vmem:[%s1272_s1 + $0x18] sm:$0xff] }
  0x1d   : > { %502 = vmatpush.bf16.msra.mxu1 %v988_v19  ;;  %v327_v30 = vsel %vm309_vm0, %v300_v21, %v318_v25  ;;  %v256_v41 = vld [vmem:[%s1085_s7] sm:$0xff]  ;;  %v292_v48 = vld [vmem:[%s1273_s2 + $0x18] sm:$0xff]  ;;  %v266_v50 = vunpack.c.h.bf16 %v258_v42  ;;  %v272_v52 = vld [vmem:[%s1272_s1 + $0x8] sm:$0xff] }
  0x1e   : > { %v330_v33 = vsel %vm312_vm1, %v303_v23, %v321_v27  ;;  %672 = vmatpush.bf16.msra.mxu3 %v997_v24  ;;  %v271_v43 = vld [vmem:[%s1272_s1] sm:$0xff]  ;;  %v262_v44 = vunpack.c.l.bf16 %v256_v41  ;;  %v263_v49 = vunpack.c.h.bf16 %v256_v41  ;;  %v306_v51 = vadd.f32 %v297_v38, %v288_v40  ;;  %v290_v54 = vld [vmem:[%s1273_s2 + $0x8] sm:$0xff]  ;;  %v995_v56 = vld [vmem:[%s1275_s4 + $0x18] sm:$0xff] }
  0x1f   : > { %v1165_v39 = vpack.c.bf16 %v330_v33, %v327_v30  ;;  %v289_v47 = vld [vmem:[%s1273_s2] sm:$0xff]  ;;  %v283_v58 = vmul.f32 %v274_v46, %v265_v45  ;;  %v977_v62 = vld [vmem:[%s1274_s3 + $0x10] sm:$0xff]  ;;  %v976_v4 = vld [vmem:[%s1274_s3 + $0x8] sm:$0xff] }
  0x20   : > { %486 = vmatpush.bf16.msra.mxu0 %v979_v26  ;;  %v275_v53 = vld [vmem:[%s1272_s1 + $0x20] sm:$0xff]  ;;  %690 = vmatpush.bf16.msrb.mxu2 %v1005_v36  ;;  %v280_v57 = vmul.f32 %v271_v43, %v262_v44  ;;  %v281_v59 = vmul.f32 %v272_v52, %v263_v49  ;;  %v985_v63 = vld [vmem:[%s1274_s3 + $0x50] sm:$0xff]  ;;  %v984_v5 = vld [vmem:[%s1274_s3 + $0x48] sm:$0xff]  ;;  %v324_v6 = vmul.f32 0.2, %v306_v51  ;;  %vm315_vm3 = vcmp.ge.f32.partialorder %v306_v51, 0.0 }
  0x21   : > { %503 = vmatpush.bf16.msra.mxu1 %v987_v28  ;;  %900 = vmatmul.msk.bf16.vlgmr.msra.gmra.mxu2 %vm476_vm2, %v1165_v39  ;;  %v1004_v55 = vld [vmem:[%s1275_s4 + $0x60] sm:$0xff]  ;;  %v284_v61 = vmul.f32 %v275_v53, %v266_v50  ;;  %v301_v1 = vadd.f32 %v292_v48, %v283_v58  ;;  %v1003_v7 = vld [vmem:[%s1275_s4 + $0x58] sm:$0xff]  ;;  %v994_v8 = vld [vmem:[%s1275_s4 + $0x10] sm:$0xff] }
  0x22   : > { %673 = vmatpush.bf16.msra.mxu3 %v996_v37  ;;  %v293_v60 = vld [vmem:[%s1273_s2 + $0x20] sm:$0xff]  ;;  %v298_v0 = vadd.f32 %v289_v47, %v280_v57  ;;  %v299_v2 = vadd.f32 %v290_v54, %v281_v59  ;;  %v260_v10 = vld [vmem:[%s1085_s7 + $0x18] sm:$0x11]  ;;  %v333_v14 = vsel %vm315_vm3, %v306_v51, %v324_v6  ;;  %v1002_v15 = vld [vmem:[%s1275_s4 + $0x50] sm:$0xff] }
  0x23   : > { %v302_v3 = vadd.f32 %v293_v60, %v284_v61  ;;  %v319_v11 = vmul.f32 0.2, %v301_v1  ;;  %vm310_vm5 = vcmp.ge.f32.partialorder %v301_v1, 0.0  ;;  %v993_v16 = vld [vmem:[%s1275_s4 + $0x8] sm:$0xff]  ;;  %v268_v18 = vunpack.c.l.bf16 %v260_v10  ;;  %v975_v19 = vld [vmem:[%s1274_s3] sm:$0xff] }
  0x24   : > { %487 = vmatpush.bf16.msra.mxu0 %v978_v34  ;;  %691 = vmatpush.bf16.msrb.mxu2 %v1004_v55  ;;  %vm307_vm4 = vcmp.ge.f32.partialorder %v298_v0, 0.0  ;;  %v316_v9 = vmul.f32 0.2, %v298_v0  ;;  %v317_v12 = vmul.f32 0.2, %v299_v2  ;;  %vm308_vm6 = vcmp.ge.f32.partialorder %v299_v2, 0.0 }
  0x25   : > { %504 = vmatpush.bf16.msra.mxu1 %v986_v35  ;;  %v320_v13 = vmul.f32 0.2, %v302_v3  ;;  %vm311_vm7 = vcmp.ge.f32.partialorder %v302_v3, 0.0  ;;  %v983_v20 = vld [vmem:[%s1274_s3 + $0x40] sm:$0xff]  ;;  %v328_v21 = vsel %vm310_vm5, %v301_v1, %v319_v11  ;;  %v269_v24 = vunpack.c.h.bf16 %v260_v10  ;;  %v277_v27 = vld [vmem:[%s1272_s1 + $0x30] sm:$0x1] }
  0x26   : > { %674 = vmatpush.bf16.msra.mxu3 %v995_v56  ;;  %v325_v17 = vsel %vm307_vm4, %v298_v0, %v316_v9  ;;  %v326_v22 = vsel %vm308_vm6, %v299_v2, %v317_v12  ;;  %v339_v25 = vpack.c.bf16 %v333_v14, %v333_v14  ;;  %v1008_v26 = vld [vmem:[%s1275_s4 + $0x80] sm:$0xff]  ;;  %v278_v28 = vld [vmem:[%s1272_s1 + $0x38] sm:$0x1]  ;;  %v1001_v29 = vld [vmem:[%s1275_s4 + $0x48] sm:$0xff]  ;;  %v286_v33 = vmul.f32 %v277_v27, %v268_v18 }
  0x27   : > { %v329_v23 = vsel %vm311_vm7, %v302_v3, %v320_v13  ;;  %v992_v30 = vld [vmem:[%s1275_s4] sm:$0xff]  ;;  %v334_v31 = vpack.c.bf16 %v328_v21, %v325_v17  ;;  %v287_v34 = vmul.f32 %v278_v28, %v269_v24  ;;  %v295_v35 = vld [vmem:[%s1273_s2 + $0x30] sm:$0x1]  ;;  %v296_v36 = vld [vmem:[%s1273_s2 + $0x38] sm:$0x1] }
  0x28   : > { %488 = vmatpush.bf16.msra.mxu0 %v977_v62  ;;  %692 = vmatpush.bf16.msrb.mxu2 %v1003_v7  ;;  %v335_v32 = vpack.c.bf16 %v329_v23, %v326_v22  ;;  %v1000_v37 = vld [vmem:[%s1275_s4 + $0x40] sm:$0xff]  ;;  %v304_v38 = vadd.f32 %v295_v35, %v286_v33 }
  0x29   : > { %505 = vmatpush.bf16.msra.mxu1 %v985_v63  ;;  %v305_v40 = vadd.f32 %v296_v36, %v287_v34 }
  0x2a   : > { %675 = vmatpush.bf16.msra.mxu3 %v994_v8  ;;  %v322_v41 = vmul.f32 0.2, %v304_v38  ;;  %vm313_vm8 = vcmp.ge.f32.partialorder %v304_v38, 0.0 }
  0x2b   : > { %v323_v42 = vmul.f32 0.2, %v305_v40  ;;  %vm314_vm9 = vcmp.ge.f32.partialorder %v305_v40, 0.0 }
  0x2c   : > { %489 = vmatpush.bf16.msra.mxu0 %v976_v4  ;;  %693 = vmatpush.bf16.msrb.mxu2 %v1002_v15  ;;  %v331_v43 = vsel %vm313_vm8, %v304_v38, %v322_v41  ;;  %v757_v41 = vld [vmem:[%s1277_s6] sm:$0x3] }
  0x2d   : > { %506 = vmatpush.bf16.msra.mxu1 %v984_v5  ;;  %v332_v44 = vsel %vm314_vm9, %v305_v40, %v323_v42  ;;  %v337_v45 = vpack.c.bf16 %v331_v43, %v331_v43 }
  0x2e   : > { %676 = vmatpush.bf16.msra.mxu3 %v993_v16  ;;  %v338_v46 = vpack.c.bf16 %v332_v44, %v332_v44 }
  0x30   : > { %490 = vmatpush.bf16.msra.mxu0 %v975_v19  ;;  %694 = vmatpush.bf16.msrb.mxu2 %v1001_v29 }
  0x31   : > { %507 = vmatpush.bf16.msra.mxu1 %v983_v20  ;;  %901 = vmatmul.msk.bf16.gmra.mxu2 %vm476_vm2, %v339_v25 }
  0x32   : > { %677 = vmatpush.bf16.msra.mxu3 %v992_v30 }
  0x33   : > { %491 = vmatmul.bf16.vlgmr.msra.gmra.mxu0 %v334_v31 }
  0x34   : > { %713 = vmatpush.bf16.msrb.mxu0 %v1008_v26  ;;  %508 = vmatmul.bf16.vlgmr.msra.gmra.mxu1 %v335_v32 }
  0x35   : > { %1014 = vmatpush.bf16.msrb.mxu1 %v1008_v26  ;;  %678 = vmatmul.bf16.vlgmr.msra.gmra.mxu3 %v334_v31 }
  0x36   : > { %695 = vmatpush.bf16.msrb.mxu2 %v1000_v37 }
  0x41   : > { %696 = vmatmul.bf16.vlgmr.msrb.gmra.mxu2 %v335_v32 }
  0x43   : > { %496 = vmatmul.bf16.gmra.mxu0 %v337_v45 }
  0x44   : > { %513 = vmatmul.bf16.gmra.mxu1 %v338_v46 }
  0x45   : > { %683 = vmatmul.bf16.gmra.mxu3 %v337_v45 }
  0x51   : > { %701 = vmatmul.bf16.gmra.mxu2 %v338_v46 }
  0x53   : > { %970 = vmatmul.msk.bf16.vlgmr.msrb.gmra.mxu0 %vm476_vm2, %v1165_v39 }
  0x54   : > { %971 = vmatmul.msk.bf16.vlgmr.msrb.gmra.mxu1 %vm476_vm2, %v339_v25 }
  0xa4   : > { %v526_v47 = vpop.f32.mrf.mxu2 }
  0xac   : > { %v528_v48 = vpop.f32.mrf.mxu2 }
  0xb0   : > { %v492_v49 = vpop.f32.mrf.mxu0 }
  0xb1   : > { %v509_v50 = vpop.f32.mrf.mxu1 }
  0xb2   : > { %v510_v8 = vadd.f32 %v509_v50, %v492_v49 }
  0xb4   : > { %v531_v51 = vpop.f32.mrf.mxu2  ;;  %v527_v16 = vadd.f32 %v526_v47, %v510_v8 }
  0xb8   : > { %v494_v52 = vpop.f32.mrf.mxu0  ;;  %v679_v54 = vpop.f32.mrf.mxu3 }
  0xb9   : > { %v511_v53 = vpop.f32.mrf.mxu1 }
  0xba   : > { %v512_v9 = vadd.f32 %v511_v53, %v494_v52 }
  0xbc   : > { %v532_v55 = vpop.f32.mrf.mxu2  ;;  %v529_v17 = vadd.f32 %v528_v48, %v512_v9 }
  0xc0   : > { %v497_v56 = vpop.f32.mrf.mxu0  ;;  %v681_v58 = vpop.f32.mrf.mxu3 }
  0xc1   : > { %v514_v57 = vpop.f32.mrf.mxu1 }
  0xc4   : > { %v697_v59 = vpop.f32.mrf.mxu2 }
  0xc5   : > { %v698_v3 = vadd.f32 %v697_v59, %v679_v54 }
  0xc8   : > { %v498_v60 = vpop.f32.mrf.mxu0  ;;  %v684_v62 = vpop.f32.mrf.mxu3 }
  0xc9   : > { %v515_v61 = vpop.f32.mrf.mxu1 }
  0xcc   : > { %v699_v63 = vpop.f32.mrf.mxu2 }
  0xcd   : > { %v700_v5 = vadd.f32 %v699_v63, %v681_v58 }
  0xd0   : > { %v715_v39 = vpop.f32.mrf.mxu0  ;;  %v686_v1 = vpop.f32.mrf.mxu3 }
  0xd1   : > { %v720_v0 = vpop.f32.mrf.mxu1  ;;  %v716_v6 = vadd.f32 %v715_v39, %v698_v3 }
  0xd3   : > { %v728_v14 = vrot.slane %v716_v6, 1 }
  0xd4   : > { %v702_v2 = vpop.f32.mrf.mxu2 }
  0xd5   : > { %v703_v4 = vadd.f32 %v702_v2, %v684_v62 }
  0xd7   : > { %v721_v7 = vadd.f32 %v720_v0, %v703_v4 }
  0xd8   : > { %v717_v10 = vpop.f32.mrf.mxu0 }
  0xd9   : > { %v722_v11 = vpop.f32.mrf.mxu1  ;;  %v731_v12 = vrot.slane %v721_v7, 1  ;;  %v718_v13 = vadd.f32 %v717_v10, %v700_v5 }
  0xdb   : > { %v729_v15 = vrot.slane %v718_v13, 1 }
  0xdc   : > { %v704_v18 = vpop.f32.mrf.mxu2 }
  0xdd   : > { %v730_v19 = vsel %vm727_vm10, %v728_v14, %v729_v15  ;;  %v732_v20 = vsel %vm727_vm10, %v729_v15, %v731_v12 }
  0xde   : > { %v735_v21 = vadd.f32 %v730_v19, %v527_v16  ;;  %v736_v22 = vadd.f32 %v732_v20, %v529_v17 }
  0xe0   : > { %v1012_v23 = vpack.c.bf16 %v736_v22, %v735_v21  ;;  %v741_v24 = vadd.f32 %v736_v22, %v735_v21  ;;  %v748_v25 = vmul.f32 %v735_v21, %v735_v21  ;;  %v749_v26 = vmul.f32 %v736_v22, %v736_v22 }
  0xe2   : > { %1013 = vst [vmem:[%s1080_s28] sm:$0xff] %v1012_v23   ;;  %v742_v27 = vrot.slane %v741_v24, 4  ;;  %v750_v28 = vadd.f32 %v749_v26, %v748_v25 }
  0xe4   : > { %v743_v29 = vadd.f32 %v742_v27, %v741_v24  ;;  %v751_v30 = vrot.slane %v750_v28, 4 }
  0xe6   : > { %v744_v31 = vrot.slane %v743_v29, 2  ;;  %v752_v32 = vadd.f32 %v751_v30, %v750_v28 }
  0xe8   : > { %v745_v33 = vadd.f32 %v744_v31, %v743_v29  ;;  %v753_v34 = vrot.slane %v752_v32, 2 }
  0xea   : > { %v746_v35 = vrot.slane %v745_v33, 1  ;;  %v754_v36 = vadd.f32 %v753_v34, %v752_v32 }
  0xec   : > { %v755_v37 = vrot.slane %v754_v36, 1  ;;  %v747_v38 = vadd.f32 %v746_v35, %v745_v33 }
  0xee   : > { %v756_v40 = vadd.f32 %v755_v37, %v754_v36 }
  0xf0   : > { %v759_v42 = vsel %vm758_vm11, %v747_v38, %v756_v40 }
  0xf1   : > { %v760_v43 = vadd.f32 %v759_v42, %v757_v41 }
  0xf3   : > { %761 = vst [vmem:[%s1277_s6] sm:$0x3] %v760_v43 }
  0xf4 PF: > { %s17_s21 = sadd.s32 1, %s1031_s21  }
  0xf5   : > { %p14_p5 = scmp.ge.s32.totalorder %s17_s21, 4  }
  0xf7   :  { %16 = sbr.rel (!%p14_p5) target bundleno = 1 (0x1), region = 82 }

// kernel: discriminator_forward.7
= control target key start
LH: loop header
LB: loop body
LE: loop exit
PB: predicated region body
PF: predicated region fallthrough
CT: control target
= control target key end

     0   :  { %s1015_s21 = smov 0   ;;  %s1201_s0 = inlined_call_operand.vmem [shape: bf16[2,9,288], index: 0, kind: input, shape index: {}]   ;;  %s1202_s1 = inlined_call_operand.vmem [shape: f32[9,288], index: 1, kind: input, shape index: {}]   ;;  %s1203_s2 = inlined_call_operand.vmem [shape: f32[9,288], index: 2, kind: input, shape index: {}]   ;;  %s1204_s3 = inlined_call_operand.vmem [shape: bf16[288,128], index: 3, kind: input, shape index: {}]   ;;  %s1205_s4 = inlined_call_operand.vmem [shape: bf16[288,128], index: 4, kind: input, shape index: {}]   ;;  %s1206_s5 = inlined_call_operand.vmem [shape: bf16[2,8,128], index: 5, kind: output, shape index: {0}]   ;;  %s1207_s6 = inlined_call_operand.vmem [shape: f32[2,128], index: 6, kind: output, shape index: {1}]  }
   0x1 LB: > { %s769_s22 = sadd.s32 4294967295, %s977_s21   ;;  %p773_p0 = scmp.ge.s32.totalorder %s977_s21, 1  ;;  %s977_s21 = sphi %s1015_s21, %s17_s21  }
   0x2   : > { %p210_p1 = scmp.lt.s32.totalorder %s977_s21, 3 }
   0x4   : > { %p211_p2 = pnand %p773_p0, %p210_p1 }
   0x5   : > { %p239_p3 = scmp.lt.s32.totalorder (!%p211_p2), %s769_s22, 1  ;;  %p776_p4 = scmp.ne.s32.totalorder (!%p211_p2), %s769_s22, 0 }
   0x6   : > { %214 = sbr.rel (%p211_p2) target bundleno = 226 (0xe2), region = 40 }
   0xb   : > { %s240_s23 = scalar_select %p239_p3, %s769_s22, 1 }
   0xc   : > { %252 = sbr.rel (%p776_p4) target bundleno = 19 (0x13), region = 44 }
   0xd   : > { %s961_s24 = smul.u32 24, %s240_s23  ;;  %s775_s25 = sshll.u32 %s240_s23, 2 }
   0xe   : > { %s1026_s28 = scalar_lea.vmem %s1206_s5, %s775_s25 }
   0xf   : > { %s1031_s7 = scalar_lea.vmem %s1201_s0, %s961_s24 }
  0x11   : > { %v979_v0 = vmov 0.0  }
  0x12   : > { %253 = vst [vmem:[%s1207_s6] sm:$0x3] %v979_v0 }
  0x13 PF: > { %v932_v1 = vld [vmem:[%s1204_s3 + $0x38] sm:$0xff]  ;;  %v942_v3 = vld [vmem:[%s1204_s3 + $0x88] sm:$0xff]  ;;  %v931_v5 = vld [vmem:[%s1204_s3 + $0x30] sm:$0xff]  ;;  %vm453_vm2 = vcmask 261120   ;;  %vm684_vm7 = vcmask 1046528   ;;  %vm706_vm8 = vcmask 1040384  }
  0x14   : > { %v940_v2 = vld [vmem:[%s1204_s3 + $0x78] sm:$0xff]  ;;  %457 = vmatpush.bf16.msra.mxu0 %v932_v1  ;;  %v939_v6 = vld [vmem:[%s1204_s3 + $0x70] sm:$0xff]  ;;  %489 = vmatpush.bf16.msra.mxu2 %v942_v3  ;;  %v941_v7 = vld [vmem:[%s1204_s3 + $0x80] sm:$0xff] }
  0x15   : > { %v950_v4 = vld [vmem:[%s1205_s4 + $0x38] sm:$0xff]  ;;  %470 = vmatpush.bf16.msra.mxu1 %v940_v2  ;;  %v949_v8 = vld [vmem:[%s1205_s4 + $0x30] sm:$0xff]  ;;  %v930_v10 = vld [vmem:[%s1204_s3 + $0x28] sm:$0xff] }
  0x16   : > { %640 = vmatpush.bf16.msra.mxu3 %v950_v4  ;;  %v958_v9 = vld [vmem:[%s1205_s4 + $0x78] sm:$0xff]  ;;  %v938_v11 = vld [vmem:[%s1204_s3 + $0x68] sm:$0xff]  ;;  %v257_v13 = vld [vmem:[%s1031_s7 + $0x14] sm:$0x1] }
  0x17   : > { %v255_v12 = vld [vmem:[%s1031_s7 + $0x8] sm:$0xf]  ;;  %v266_v15 = vld [vmem:[%s1202_s1 + $0x10] sm:$0xff]  ;;  %v263_v18 = vunpack.c.l.bf16 %v257_v13  ;;  %v929_v24 = vld [vmem:[%s1204_s3 + $0x20] sm:$0xff] }
  0x18   : > { %458 = vmatpush.bf16.msra.mxu0 %v931_v5  ;;  %v260_v14 = vunpack.c.l.bf16 %v255_v12  ;;  %v269_v16 = vld [vmem:[%s1202_s1 + $0x28] sm:$0x1]  ;;  %490 = vmatpush.bf16.msra.mxu2 %v941_v7  ;;  %v278_v19 = vld [vmem:[%s1203_s2 + $0x10] sm:$0xff]  ;;  %v937_v25 = vld [vmem:[%s1204_s3 + $0x60] sm:$0xff] }
  0x19   : > { %471 = vmatpush.bf16.msra.mxu1 %v939_v6  ;;  %v948_v17 = vld [vmem:[%s1205_s4 + $0x28] sm:$0xff]  ;;  %v957_v20 = vld [vmem:[%s1205_s4 + $0x70] sm:$0xff]  ;;  %v275_v23 = vmul.f32 %v269_v16, %v263_v18  ;;  %v947_v27 = vld [vmem:[%s1205_s4 + $0x20] sm:$0xff] }
  0x1a   : > { %641 = vmatpush.bf16.msra.mxu3 %v949_v8  ;;  %v272_v21 = vmul.f32 %v266_v15, %v260_v14  ;;  %v281_v22 = vld [vmem:[%s1203_s2 + $0x28] sm:$0x1]  ;;  %v928_v31 = vld [vmem:[%s1204_s3 + $0x18] sm:$0xff]  ;;  %v254_v35 = vld [vmem:[%s1031_s7] sm:$0xff] }
  0x1b   : > { %v287_v28 = vadd.f32 %v281_v22, %v275_v23  ;;  %v956_v29 = vld [vmem:[%s1205_s4 + $0x68] sm:$0xff]  ;;  %v936_v33 = vld [vmem:[%s1204_s3 + $0x58] sm:$0xff]  ;;  %v258_v38 = vunpack.c.l.bf16 %v254_v35  ;;  %v264_v40 = vld [vmem:[%s1202_s1] sm:$0xff]  ;;  %v259_v43 = vunpack.c.h.bf16 %v254_v35 }
  0x1c   : > { %654 = vmatpush.bf16.msrb.mxu2 %v958_v9  ;;  %459 = vmatpush.bf16.msra.mxu0 %v930_v10  ;;  %v284_v26 = vadd.f32 %v278_v19, %v272_v21  ;;  %v946_v34 = vld [vmem:[%s1205_s4 + $0x18] sm:$0xff]  ;;  %v256_v36 = vld [vmem:[%s1031_s7 + $0xc] sm:$0x11]  ;;  %v276_v42 = vld [vmem:[%s1203_s2] sm:$0xff] }
  0x1d   : > { %472 = vmatpush.bf16.msra.mxu1 %v938_v11  ;;  %vm293_vm1 = vcmp.ge.f32.partialorder %v287_v28, 0.0  ;;  %v299_v32 = vmul.f32 0.2, %v287_v28  ;;  %v261_v39 = vunpack.c.l.bf16 %v256_v36  ;;  %v267_v41 = vld [vmem:[%s1202_s1 + $0x18] sm:$0x1]  ;;  %v262_v46 = vunpack.c.h.bf16 %v256_v36  ;;  %v265_v47 = vld [vmem:[%s1202_s1 + $0x8] sm:$0xff] }
  0x1e   : > { %642 = vmatpush.bf16.msra.mxu3 %v948_v17  ;;  %vm290_vm0 = vcmp.ge.f32.partialorder %v284_v26, 0.0  ;;  %v296_v30 = vmul.f32 0.2, %v284_v26  ;;  %v279_v45 = vld [vmem:[%s1203_s2 + $0x18] sm:$0x1]  ;;  %v955_v50 = vld [vmem:[%s1205_s4 + $0x60] sm:$0xff]  ;;  %v270_v51 = vmul.f32 %v264_v40, %v258_v38  ;;  %v271_v53 = vmul.f32 %v265_v47, %v259_v43 }
  0x1f   : > { %v305_v44 = vsel %vm293_vm1, %v287_v28, %v299_v32  ;;  %v268_v48 = vld [vmem:[%s1202_s1 + $0x20] sm:$0x1]  ;;  %v273_v52 = vmul.f32 %v267_v41, %v261_v39  ;;  %v277_v54 = vld [vmem:[%s1203_s2 + $0x8] sm:$0xff]  ;;  %v927_v57 = vld [vmem:[%s1204_s3 + $0x10] sm:$0xff] }
  0x20   : > { %655 = vmatpush.bf16.msrb.mxu2 %v957_v20  ;;  %460 = vmatpush.bf16.msra.mxu0 %v929_v24  ;;  %v302_v37 = vsel %vm290_vm0, %v284_v26, %v296_v30  ;;  %v280_v55 = vld [vmem:[%s1203_s2 + $0x20] sm:$0x1]  ;;  %v274_v56 = vmul.f32 %v268_v48, %v262_v46  ;;  %v282_v58 = vadd.f32 %v276_v42, %v270_v51  ;;  %v935_v60 = vld [vmem:[%s1204_s3 + $0x50] sm:$0xff]  ;;  %v954_v0 = vld [vmem:[%s1205_s4 + $0x58] sm:$0xff] }
  0x21   : > { %473 = vmatpush.bf16.msra.mxu1 %v937_v25  ;;  %v1131_v49 = vpack.c.bf16 %v305_v44, %v302_v37  ;;  %v285_v59 = vadd.f32 %v279_v45, %v273_v52  ;;  %v945_v61 = vld [vmem:[%s1205_s4 + $0x10] sm:$0xff]  ;;  %v283_v62 = vadd.f32 %v277_v54, %v271_v53  ;;  %v926_v1 = vld [vmem:[%s1204_s3 + $0x8] sm:$0xff]  ;;  %v925_v9 = vld [vmem:[%s1204_s3] sm:$0xff] }
  0x22   : > { %643 = vmatpush.bf16.msra.mxu3 %v947_v27  ;;  %v286_v63 = vadd.f32 %v280_v55, %v274_v56  ;;  %v934_v2 = vld [vmem:[%s1204_s3 + $0x48] sm:$0xff]  ;;  %v294_v4 = vmul.f32 0.2, %v282_v58  ;;  %vm288_vm3 = vcmp.ge.f32.partialorder %v282_v58, 0.0  ;;  %v953_v8 = vld [vmem:[%s1205_s4 + $0x50] sm:$0xff]  ;;  %v933_v12 = vld [vmem:[%s1204_s3 + $0x40] sm:$0xff] }
  0x23   : > { %849 = vmatmul.msk.bf16.vlgmr.msra.gmra.mxu2 %vm453_vm2, %v1131_v49  ;;  %v944_v3 = vld [vmem:[%s1205_s4 + $0x8] sm:$0xff]  ;;  %v297_v5 = vmul.f32 0.2, %v285_v59  ;;  %vm291_vm4 = vcmp.ge.f32.partialorder %v285_v59, 0.0  ;;  %v295_v6 = vmul.f32 0.2, %v283_v62 }
  0x24   : > { %656 = vmatpush.bf16.msrb.mxu2 %v956_v29  ;;  %461 = vmatpush.bf16.msra.mxu0 %v928_v31  ;;  %v298_v7 = vmul.f32 0.2, %v286_v63  ;;  %vm289_vm5 = vcmp.ge.f32.partialorder %v283_v62, 0.0  ;;  %vm292_vm6 = vcmp.ge.f32.partialorder %v286_v63, 0.0  ;;  %v300_v10 = vsel %vm288_vm3, %v282_v58, %v294_v4  ;;  %v943_v13 = vld [vmem:[%s1205_s4] sm:$0xff]  ;;  %v952_v16 = vld [vmem:[%s1205_s4 + $0x48] sm:$0xff] }
  0x25   : > { %474 = vmatpush.bf16.msra.mxu1 %v936_v33  ;;  %v303_v11 = vsel %vm291_vm4, %v285_v59, %v297_v5  ;;  %v301_v14 = vsel %vm289_vm5, %v283_v62, %v295_v6  ;;  %v960_v17 = vld [vmem:[%s1205_s4 + $0x88] sm:$0xff]  ;;  %v951_v20 = vld [vmem:[%s1205_s4 + $0x40] sm:$0xff] }
  0x26   : > { %644 = vmatpush.bf16.msra.mxu3 %v946_v34  ;;  %v304_v15 = vsel %vm292_vm6, %v286_v63, %v298_v7  ;;  %v306_v18 = vpack.c.bf16 %v303_v11, %v300_v10  ;;  %v959_v21 = vld [vmem:[%s1205_s4 + $0x80] sm:$0xff] }
  0x27   : > { %v307_v19 = vpack.c.bf16 %v304_v15, %v301_v14  ;;  %v705_v58 = vld [vmem:[%s1207_s6] sm:$0x3] }
  0x28   : > { %657 = vmatpush.bf16.msrb.mxu2 %v955_v50  ;;  %462 = vmatpush.bf16.msra.mxu0 %v927_v57 }
  0x29   : > { %475 = vmatpush.bf16.msra.mxu1 %v935_v60 }
  0x2a   : > { %645 = vmatpush.bf16.msra.mxu3 %v945_v61 }
  0x2c   : > { %658 = vmatpush.bf16.msrb.mxu2 %v954_v0  ;;  %463 = vmatpush.bf16.msra.mxu0 %v926_v1 }
  0x2d   : > { %476 = vmatpush.bf16.msra.mxu1 %v934_v2 }
  0x2e   : > { %646 = vmatpush.bf16.msra.mxu3 %v944_v3 }
  0x30   : > { %659 = vmatpush.bf16.msrb.mxu2 %v953_v8  ;;  %464 = vmatpush.bf16.msra.mxu0 %v925_v9 }
  0x31   : > { %477 = vmatpush.bf16.msra.mxu1 %v933_v12 }
  0x32   : > { %647 = vmatpush.bf16.msra.mxu3 %v943_v13 }
  0x33   : > { %465 = vmatmul.bf16.vlgmr.msra.gmra.mxu0 %v306_v18 }
  0x34   : > { %660 = vmatpush.bf16.msrb.mxu2 %v952_v16  ;;  %674 = vmatpush.bf16.msrb.mxu0 %v960_v17 }
  0x35   : > { %478 = vmatmul.bf16.vlgmr.msra.gmra.mxu1 %v307_v19  ;;  %648 = vmatmul.bf16.vlgmr.msra.gmra.mxu3 %v306_v18 }
  0x38   : > { %661 = vmatpush.bf16.msrb.mxu2 %v951_v20  ;;  %675 = vmatpush.bf16.msrb.mxu0 %v959_v21 }
  0x3b   : > { %662 = vmatmul.bf16.vlgmr.msrb.gmra.mxu2 %v307_v19 }
  0x43   : > { %922 = vmatmul.msk.bf16.vlgmr.msrb.gmra.mxu0 %vm453_vm2, %v1131_v49 }
  0xa6   : > { %v492_v22 = vpop.f32.mrf.mxu2 }
  0xae   : > { %v494_v23 = vpop.f32.mrf.mxu2 }
  0xb0   : > { %v466_v24 = vpop.f32.mrf.mxu0 }
  0xb2   : > { %v479_v25 = vpop.f32.mrf.mxu1 }
  0xb3   : > { %v480_v36 = vadd.f32 %v479_v25, %v466_v24 }
  0xb5   : > { %v493_v41 = vadd.f32 %v492_v22, %v480_v36 }
  0xb8   : > { %v468_v26 = vpop.f32.mrf.mxu0  ;;  %v649_v28 = vpop.f32.mrf.mxu3 }
  0xba   : > { %v481_v27 = vpop.f32.mrf.mxu1 }
  0xbe   : > { %v663_v29 = vpop.f32.mrf.mxu2 }
  0xbf   : > { %v664_v31 = vadd.f32 %v663_v29, %v649_v28 }
  0xc0   : > { %v677_v30 = vpop.f32.mrf.mxu0  ;;  %v651_v33 = vpop.f32.mrf.mxu3 }
  0xc1   : > { %v678_v34 = vadd.f32 %v677_v30, %v664_v31 }
  0xc3   : > { %v685_v39 = vrot.slane %v678_v34, 1 }
  0xc6   : > { %v665_v32 = vpop.f32.mrf.mxu2 }
  0xc7   : > { %v666_v35 = vadd.f32 %v665_v32, %v651_v33 }
  0xc8   : > { %v679_v37 = vpop.f32.mrf.mxu0 }
  0xc9   : > { %v680_v38 = vadd.f32 %v679_v37, %v666_v35 }
  0xcb   : > { %v686_v40 = vrot.slane %v680_v38, 1 }
  0xcd   : > { %v687_v42 = vsel %vm684_vm7, %v685_v39, %v686_v40 }
  0xce   : > { %v689_v43 = vadd.f32 %v687_v42, %v493_v41 }
  0xd0   : > { %v690_v44 = vpack.c.bf16 %v689_v43, %v689_v43  ;;  %v692_v45 = vrot.slane %v689_v43, 4  ;;  %v698_v46 = vmul.f32 %v689_v43, %v689_v43 }
  0xd2   : > { %691 = vst [vmem:[%s1026_s28] sm:$0xf] %v690_v44  ;;  %v693_v47 = vadd.f32 %v692_v45, %v689_v43  ;;  %v699_v48 = vrot.slane %v698_v46, 4 }
  0xd4   : > { %v694_v49 = vrot.slane %v693_v47, 2  ;;  %v700_v50 = vadd.f32 %v699_v48, %v698_v46 }
  0xd6   : > { %v695_v51 = vadd.f32 %v694_v49, %v693_v47  ;;  %v701_v52 = vrot.slane %v700_v50, 2 }
  0xd8   : > { %v696_v53 = vrot.slane %v695_v51, 1  ;;  %v702_v54 = vadd.f32 %v701_v52, %v700_v50 }
  0xda   : > { %v703_v55 = vrot.slane %v702_v54, 1  ;;  %v697_v56 = vadd.f32 %v696_v53, %v695_v51 }
  0xdc   : > { %v704_v57 = vadd.f32 %v703_v55, %v702_v54 }
  0xde   : > { %v707_v59 = vsel %vm706_vm8, %v697_v56, %v704_v57 }
  0xdf   : > { %v708_v60 = vadd.f32 %v707_v59, %v705_v58 }
  0xe1   : > { %709 = vst [vmem:[%s1207_s6] sm:$0x3] %v708_v60 }
  0xe2 PF: > { %s17_s21 = sadd.s32 1, %s977_s21  }
  0xe3   : > { %p14_p5 = scmp.ge.s32.totalorder %s17_s21, 4  }
  0xe5   :  { %16 = sbr.rel (!%p14_p5) target bundleno = 1 (0x1), region = 82 }

// kernel: tile.13
= control target key start
LH: loop header
LB: loop body
LE: loop exit
PB: predicated region body
PF: predicated region fallthrough
CT: control target
= control target key end

     0   :  { %s22_s0 = inlined_call_operand.vmem [shape: f32[32], index: 0, kind: input, shape index: {}]   ;;  %s23_s1 = inlined_call_operand.vmem [shape: f32[4,32], index: 1, kind: output, shape index: {}]  }
   0x1   :  { %v4_v0 = vld [vmem:[%s22_s0] ss:$0 sm:$0xff] }
   0x2   :  { %5 = vst [vmem:[%s23_s1] sm:$0xf] %v4_v0 }

// kernel: tile.14
= control target key start
LH: loop header
LB: loop body
LE: loop exit
PB: predicated region body
PF: predicated region fallthrough
CT: control target
= control target key end

     0   :  { %s37_s8 = smov 32   ;;  %s38_s9 = smov 64   ;;  %vm7_vm0 = vcmask 261120   ;;  %vm13_vm1 = vcmask 1048320   ;;  %vm19_vm2 = vcmask 785920   ;;  %vm25_vm3 = vcmask 523520   ;;  %s55_s0 = inlined_call_operand.vmem [shape: f32[4,32], index: 0, kind: input, shape index: {}]   ;;  %s56_s1 = inlined_call_operand.vmem [shape: f32[1,128], index: 1, kind: output, shape index: {}]  }
   0x1   :  { %v4_v0 = vld [vmem:[%s55_s0] sm:$0xf]  ;;  %s36_s0 = smov 96  }
   0x2   :  { %5 = vst [vmem:[#allocation1] sm:$0xf] %v4_v0 }
   0x9   :  { %v10_v1 = vld [vmem:[#allocation1 + $0x3] sm:$0x1]   ;;  %v22_v2 = vld [vmem:[#allocation1 + $0x1] sm:$0x1]   ;;  %v16_v3 = vld [vmem:[#allocation1 + $0x2] sm:$0x1]  }
   0xa   :  { %11 = vrot.lane.b32.xlu0 %v10_v1, %s36_s0  ;;  %23 = vrot.lane.b32.xlu1 %v22_v2, %s37_s8  ;;  %v6_v4 = vld [vmem:[#allocation1] sm:$0x1]  }
   0xb   :  { %8 = vst.msk [vmem:[#allocation0] sm:$0x1] %vm7_vm0, %v6_v4  }
  0x12   :  { %17 = vrot.lane.b32.xlu0 %v16_v3, %s38_s9 }
  0x7c   :  { %v12_v5 = vpop.permute.xlu0 %11   ;;  %v24_v6 = vpop.permute.xlu1 %23  }
  0x7d   :  { %14 = vst.msk [vmem:[#allocation0] sm:$0x1] %vm13_vm1, %v12_v5  }
  0x84   :  { %v18_v7 = vpop.permute.xlu0 %17  }
  0x85   :  { %20 = vst.msk [vmem:[#allocation0] sm:$0x1] %vm19_vm2, %v18_v7  }
  0x86   :  { %26 = vst.msk [vmem:[#allocation0] sm:$0x1] %vm25_vm3, %v24_v6  }
  0x8d   :  { %v29_v8 = vld [vmem:[#allocation0] sm:$0x1] }
  0x8e   :  { %32 = vst [vmem:[%s56_s1] sm:$0x1] %v29_v8 }

// kernel: discriminator_forward.8
= control target key start
LH: loop header
LB: loop body
LE: loop exit
PB: predicated region body
PF: predicated region fallthrough
CT: control target
= control target key end

     0   :  { %s1037_s21 = smov 0   ;;  %s1210_s0 = inlined_call_operand.vmem [shape: bf16[2,5,320], index: 0, kind: input, shape index: {}]   ;;  %s1211_s1 = inlined_call_operand.vmem [shape: f32[5,320], index: 1, kind: input, shape index: {}]   ;;  %s1212_s2 = inlined_call_operand.vmem [shape: f32[5,320], index: 2, kind: input, shape index: {}]   ;;  %s1213_s3 = inlined_call_operand.vmem [shape: bf16[320,128], index: 3, kind: input, shape index: {}]   ;;  %s1214_s4 = inlined_call_operand.vmem [shape: bf16[320,128], index: 4, kind: input, shape index: {}]   ;;  %s1215_s5 = inlined_call_operand.vmem [shape: bf16[2,4,128], index: 5, kind: output, shape index: {0}]   ;;  %s1216_s6 = inlined_call_operand.vmem [shape: f32[2,128], index: 6, kind: output, shape index: {1}]  }
   0x1 LB: > { %s771_s22 = sadd.s32 4294967295, %s999_s21   ;;  %p775_p0 = scmp.ge.s32.totalorder %s999_s21, 1  ;;  %s999_s21 = sphi %s1037_s21, %s17_s21  }
   0x2   : > { %p210_p1 = scmp.lt.s32.totalorder %s999_s21, 3 }
   0x4   : > { %p211_p2 = pnand %p775_p0, %p210_p1 }
   0x5   : > { %p239_p3 = scmp.lt.s32.totalorder (!%p211_p2), %s771_s22, 1  ;;  %p778_p4 = scmp.ne.s32.totalorder (!%p211_p2), %s771_s22, 0 }
   0x6   : > { %214 = sbr.rel (%p211_p2) target bundleno = 227 (0xe3), region = 40 }
   0xb   : > { %s240_s23 = scalar_select %p239_p3, %s771_s22, 1 }
   0xc   : > { %252 = sbr.rel (%p778_p4) target bundleno = 19 (0x13), region = 44 }
   0xd   : > { %s983_s24 = smul.u32 12, %s240_s23  ;;  %s777_s25 = sshll.u32 %s240_s23, 1 }
   0xe   : > { %s1048_s28 = scalar_lea.vmem %s1215_s5, %s777_s25 }
   0xf   : > { %s1053_s7 = scalar_lea.vmem %s1210_s0, %s983_s24 }
  0x11   : > { %v1001_v0 = vmov 0.0  }
  0x12   : > { %253 = vst [vmem:[%s1216_s6] sm:$0x3] %v1001_v0 }
  0x13 PF: > { %v950_v1 = vld [vmem:[%s1213_s3 + $0x38] sm:$0xff]  ;;  %v949_v4 = vld [vmem:[%s1213_s3 + $0x30] sm:$0xff]  ;;  %v948_v9 = vld [vmem:[%s1213_s3 + $0x28] sm:$0xff]  ;;  %vm443_vm1 = vcmask 523264   ;;  %vm691_vm4 = vcmask 1043456   ;;  %vm708_vm5 = vcmask 1040384  }
  0x14   : > { %v962_v2 = vld [vmem:[%s1213_s3 + $0x98] sm:$0xff]  ;;  %447 = vmatpush.bf16.msra.mxu0 %v950_v1  ;;  %v961_v5 = vld [vmem:[%s1213_s3 + $0x90] sm:$0xff]  ;;  %v960_v10 = vld [vmem:[%s1213_s3 + $0x88] sm:$0xff] }
  0x15   : > { %v958_v3 = vld [vmem:[%s1213_s3 + $0x78] sm:$0xff]  ;;  %477 = vmatpush.bf16.msra.mxu2 %v962_v2  ;;  %v957_v7 = vld [vmem:[%s1213_s3 + $0x70] sm:$0xff]  ;;  %v956_v11 = vld [vmem:[%s1213_s3 + $0x68] sm:$0xff] }
  0x16   : > { %v970_v6 = vld [vmem:[%s1214_s4 + $0x38] sm:$0xff]  ;;  %460 = vmatpush.bf16.msra.mxu1 %v958_v3  ;;  %v969_v8 = vld [vmem:[%s1214_s4 + $0x30] sm:$0xff]  ;;  %v255_v12 = vld [vmem:[%s1053_s7 + $0x8] sm:$0x7] }
  0x17   : > { %646 = vmatpush.bf16.msra.mxu3 %v970_v6  ;;  %v261_v13 = vld [vmem:[%s1211_s1 + $0x10] sm:$0x1f]  ;;  %v968_v14 = vld [vmem:[%s1214_s4 + $0x28] sm:$0xff]  ;;  %v258_v15 = vunpack.c.l.bf16 %v255_v12  ;;  %v947_v17 = vld [vmem:[%s1213_s3 + $0x20] sm:$0xff] }
  0x18   : > { %448 = vmatpush.bf16.msra.mxu0 %v949_v4  ;;  %v267_v16 = vld [vmem:[%s1212_s2 + $0x10] sm:$0x1f]  ;;  %v959_v18 = vld [vmem:[%s1213_s3 + $0x80] sm:$0xff]  ;;  %v978_v21 = vld [vmem:[%s1214_s4 + $0x78] sm:$0xff] }
  0x19   : > { %478 = vmatpush.bf16.msra.mxu2 %v961_v5  ;;  %v264_v19 = vmul.f32 %v261_v13, %v258_v15  ;;  %v955_v20 = vld [vmem:[%s1213_s3 + $0x60] sm:$0xff]  ;;  %v260_v28 = vld [vmem:[%s1211_s1 + $0x8] sm:$0x1f]  ;;  %v946_v29 = vld [vmem:[%s1213_s3 + $0x18] sm:$0xff] }
  0x1a   : > { %461 = vmatpush.bf16.msra.mxu1 %v957_v7  ;;  %v254_v22 = vld [vmem:[%s1053_s7] sm:$0x77]  ;;  %v954_v32 = vld [vmem:[%s1213_s3 + $0x58] sm:$0xff]  ;;  %v977_v33 = vld [vmem:[%s1214_s4 + $0x70] sm:$0xff] }
  0x1b   : > { %647 = vmatpush.bf16.msra.mxu3 %v969_v8  ;;  %v967_v23 = vld [vmem:[%s1214_s4 + $0x20] sm:$0xff]  ;;  %v270_v24 = vadd.f32 %v267_v16, %v264_v19  ;;  %v256_v25 = vunpack.c.l.bf16 %v254_v22  ;;  %v257_v27 = vunpack.c.h.bf16 %v254_v22  ;;  %v966_v37 = vld [vmem:[%s1214_s4 + $0x18] sm:$0xff]  ;;  %v266_v38 = vld [vmem:[%s1212_s2 + $0x8] sm:$0x1f] }
  0x1c   : > { %449 = vmatpush.bf16.msra.mxu0 %v948_v9  ;;  %v259_v26 = vld [vmem:[%s1211_s1] sm:$0x1f]  ;;  %v945_v40 = vld [vmem:[%s1213_s3 + $0x10] sm:$0xff]  ;;  %v976_v43 = vld [vmem:[%s1214_s4 + $0x68] sm:$0xff] }
  0x1d   : > { %479 = vmatpush.bf16.msra.mxu2 %v960_v10  ;;  %vm273_vm0 = vcmp.ge.f32.partialorder %v270_v24, 0.0  ;;  %v276_v30 = vmul.f32 0.2, %v270_v24  ;;  %v262_v31 = vmul.f32 %v259_v26, %v256_v25  ;;  %v265_v34 = vld [vmem:[%s1212_s2] sm:$0x1f]  ;;  %v263_v35 = vmul.f32 %v260_v28, %v257_v27  ;;  %v953_v42 = vld [vmem:[%s1213_s3 + $0x50] sm:$0xff] }
  0x1e   : > { %462 = vmatpush.bf16.msra.mxu1 %v956_v11  ;;  %v965_v45 = vld [vmem:[%s1214_s4 + $0x10] sm:$0xff]  ;;  %v944_v46 = vld [vmem:[%s1213_s3 + $0x8] sm:$0xff]  ;;  %v975_v49 = vld [vmem:[%s1214_s4 + $0x60] sm:$0xff] }
  0x1f   : > { %648 = vmatpush.bf16.msra.mxu3 %v968_v14  ;;  %v279_v36 = vsel %vm273_vm0, %v270_v24, %v276_v30  ;;  %v268_v41 = vadd.f32 %v265_v34, %v262_v31  ;;  %v269_v44 = vadd.f32 %v266_v38, %v263_v35  ;;  %v952_v48 = vld [vmem:[%s1213_s3 + $0x48] sm:$0xff]  ;;  %v943_v52 = vld [vmem:[%s1213_s3] sm:$0xff]  ;;  %v974_v55 = vld [vmem:[%s1214_s4 + $0x58] sm:$0xff] }
  0x20   : > { %450 = vmatpush.bf16.msra.mxu0 %v947_v17  ;;  %v282_v39 = vpack.c.bf16 %v279_v36, %v279_v36  ;;  %v964_v51 = vld [vmem:[%s1214_s4 + $0x8] sm:$0xff]  ;;  %v951_v54 = vld [vmem:[%s1213_s3 + $0x40] sm:$0xff]  ;;  %v982_v57 = vld [vmem:[%s1214_s4 + $0x98] sm:$0xff] }
  0x21   : > { %480 = vmatpush.bf16.msra.mxu2 %v959_v18  ;;  %v274_v47 = vmul.f32 0.2, %v268_v41  ;;  %vm271_vm2 = vcmp.ge.f32.partialorder %v268_v41, 0.0  ;;  %v275_v50 = vmul.f32 0.2, %v269_v44  ;;  %vm272_vm3 = vcmp.ge.f32.partialorder %v269_v44, 0.0 }
  0x22   : > { %463 = vmatpush.bf16.msra.mxu1 %v955_v20  ;;  %v963_v58 = vld [vmem:[%s1214_s4] sm:$0xff]  ;;  %v973_v61 = vld [vmem:[%s1214_s4 + $0x50] sm:$0xff]  ;;  %v972_v63 = vld [vmem:[%s1214_s4 + $0x48] sm:$0xff] }
  0x23   : > { %649 = vmatpush.bf16.msra.mxu3 %v967_v23  ;;  %v277_v53 = vsel %vm271_vm2, %v268_v41, %v274_v47  ;;  %v278_v56 = vsel %vm272_vm3, %v269_v44, %v275_v50  ;;  %v981_v62 = vld [vmem:[%s1214_s4 + $0x90] sm:$0xff]  ;;  %v980_v0 = vld [vmem:[%s1214_s4 + $0x88] sm:$0xff]  ;;  %v971_v1 = vld [vmem:[%s1214_s4 + $0x40] sm:$0xff] }
  0x24   : > { %451 = vmatpush.bf16.msra.mxu0 %v946_v29  ;;  %859 = vmatmul.msk.bf16.vlgmr.msra.gmra.mxu2 %vm443_vm1, %v282_v39  ;;  %v280_v59 = vpack.c.bf16 %v277_v53, %v277_v53  ;;  %v281_v60 = vpack.c.bf16 %v278_v56, %v278_v56  ;;  %v979_v2 = vld [vmem:[%s1214_s4 + $0x80] sm:$0xff] }
  0x25   : > { %659 = vmatpush.bf16.msrb.mxu2 %v978_v21 }
  0x26   : > { %464 = vmatpush.bf16.msra.mxu1 %v954_v32 }
  0x27   : > { %650 = vmatpush.bf16.msra.mxu3 %v966_v37  ;;  %v707_v37 = vld [vmem:[%s1216_s6] sm:$0x3] }
  0x28   : > { %452 = vmatpush.bf16.msra.mxu0 %v945_v40 }
  0x29   : > { %660 = vmatpush.bf16.msrb.mxu2 %v977_v33 }
  0x2a   : > { %465 = vmatpush.bf16.msra.mxu1 %v953_v42 }
  0x2b   : > { %651 = vmatpush.bf16.msra.mxu3 %v965_v45 }
  0x2c   : > { %453 = vmatpush.bf16.msra.mxu0 %v944_v46 }
  0x2d   : > { %661 = vmatpush.bf16.msrb.mxu2 %v976_v43 }
  0x2e   : > { %466 = vmatpush.bf16.msra.mxu1 %v952_v48 }
  0x2f   : > { %652 = vmatpush.bf16.msra.mxu3 %v964_v51 }
  0x30   : > { %454 = vmatpush.bf16.msra.mxu0 %v943_v52 }
  0x31   : > { %662 = vmatpush.bf16.msrb.mxu2 %v975_v49 }
  0x32   : > { %467 = vmatpush.bf16.msra.mxu1 %v951_v54 }
  0x33   : > { %653 = vmatpush.bf16.msra.mxu3 %v963_v58  ;;  %455 = vmatmul.bf16.vlgmr.msra.gmra.mxu0 %v280_v59 }
  0x34   : > { %676 = vmatpush.bf16.msrb.mxu0 %v982_v57 }
  0x35   : > { %663 = vmatpush.bf16.msrb.mxu2 %v974_v55  ;;  %468 = vmatmul.bf16.vlgmr.msra.gmra.mxu1 %v281_v60 }
  0x36   : > { %654 = vmatmul.bf16.vlgmr.msra.gmra.mxu3 %v280_v59 }
  0x38   : > { %677 = vmatpush.bf16.msrb.mxu0 %v981_v62 }
  0x39   : > { %664 = vmatpush.bf16.msrb.mxu2 %v973_v61 }
  0x3c   : > { %678 = vmatpush.bf16.msrb.mxu0 %v980_v0 }
  0x3d   : > { %665 = vmatpush.bf16.msrb.mxu2 %v972_v63 }
  0x40   : > { %679 = vmatpush.bf16.msrb.mxu0 %v979_v2 }
  0x41   : > { %666 = vmatpush.bf16.msrb.mxu2 %v971_v1 }
  0x43   : > { %940 = vmatmul.msk.bf16.vlgmr.msrb.gmra.mxu0 %vm443_vm1, %v282_v39 }
  0x44   : > { %667 = vmatmul.bf16.vlgmr.msrb.gmra.mxu2 %v281_v60 }
  0xa7   : > { %v482_v3 = vpop.f32.mrf.mxu2 }
  0xaf   : > { %v484_v6 = vpop.f32.mrf.mxu2 }
  0xb0   : > { %v456_v4 = vpop.f32.mrf.mxu0 }
  0xb2   : > { %v469_v5 = vpop.f32.mrf.mxu1 }
  0xb3   : > { %v470_v13 = vadd.f32 %v469_v5, %v456_v4 }
  0xb5   : > { %v483_v16 = vadd.f32 %v482_v3, %v470_v13 }
  0xb8   : > { %v458_v7 = vpop.f32.mrf.mxu0 }
  0xb9   : > { %v655_v8 = vpop.f32.mrf.mxu3 }
  0xba   : > { %v471_v9 = vpop.f32.mrf.mxu1 }
  0xc0   : > { %v681_v10 = vpop.f32.mrf.mxu0 }
  0xc1   : > { %v657_v11 = vpop.f32.mrf.mxu3 }
  0xc7   : > { %v668_v12 = vpop.f32.mrf.mxu2 }
  0xc8   : > { %v669_v14 = vadd.f32 %v668_v12, %v655_v8  ;;  %v683_v18 = vpop.f32.mrf.mxu0 }
  0xca   : > { %v682_v15 = vadd.f32 %v681_v10, %v669_v14 }
  0xcc   : > { %v686_v17 = vrot.slane %v682_v15, 1 }
  0xce   : > { %v688_v19 = vadd.f32 %v686_v17, %v483_v16 }
  0xcf   : > { %v670_v20 = vpop.f32.mrf.mxu2 }
  0xd0   : > { %v689_v21 = vpack.c.bf16 %v688_v19, %v688_v19  ;;  %v692_v22 = vsel %vm691_vm4, %v688_v19, 0.0  ;;  %v699_v23 = vmul.f32 %v688_v19, %v688_v19 }
  0xd1   : > { %v693_v24 = vrot.slane %v692_v22, 4 }
  0xd2   : > { %690 = vst [vmem:[%s1048_s28] sm:$0x3] %v689_v21  ;;  %v700_v25 = vsel %vm691_vm4, %v699_v23, 0.0 }
  0xd3   : > { %v694_v26 = vadd.f32 %v693_v24, %v692_v22  ;;  %v701_v27 = vrot.slane %v700_v25, 4 }
  0xd5   : > { %v695_v28 = vrot.slane %v694_v26, 2  ;;  %v702_v29 = vadd.f32 %v701_v27, %v700_v25 }
  0xd7   : > { %v696_v30 = vadd.f32 %v695_v28, %v694_v26  ;;  %v703_v31 = vrot.slane %v702_v29, 2 }
  0xd9   : > { %v697_v32 = vrot.slane %v696_v30, 1  ;;  %v704_v33 = vadd.f32 %v703_v31, %v702_v29 }
  0xdb   : > { %v705_v34 = vrot.slane %v704_v33, 1  ;;  %v698_v35 = vadd.f32 %v697_v32, %v696_v30 }
  0xdd   : > { %v706_v36 = vadd.f32 %v705_v34, %v704_v33 }
  0xdf   : > { %v709_v38 = vsel %vm708_vm5, %v698_v35, %v706_v36 }
  0xe0   : > { %v710_v39 = vadd.f32 %v709_v38, %v707_v37 }
  0xe2   : > { %711 = vst [vmem:[%s1216_s6] sm:$0x3] %v710_v39 }
  0xe3 PF: > { %s17_s21 = sadd.s32 1, %s999_s21  }
  0xe4   : > { %p14_p5 = scmp.ge.s32.totalorder %s17_s21, 4  }
  0xe6   :  { %16 = sbr.rel (!%p14_p5) target bundleno = 1 (0x1), region = 82 }

// kernel: discriminator_forward.9
= control target key start
LH: loop header
LB: loop body
LE: loop exit
PB: predicated region body
PF: predicated region fallthrough
CT: control target
= control target key end

     0   :  { %vm110_vm6 = vcmask 1041409   ;;  %vm466_vm9 = vcmask 517120   ;;  %vm494_vm13 = vcmask 1024   ;;  %s916_s3 = inlined_call_operand.vmem [shape: bf16[4,128,64], index: 3, kind: input, shape index: {}]   ;;  %s917_s0 = inlined_call_operand.vmem [shape: bf16[2,4,128], index: 0, kind: input, shape index: {}]   ;;  %s918_s1 = inlined_call_operand.vmem [shape: f32[1,128], index: 1, kind: input, shape index: {}]   ;;  %s919_s2 = inlined_call_operand.vmem [shape: f32[1,128], index: 2, kind: input, shape index: {}]   ;;  %s920_s4 = inlined_call_operand.vmem [shape: f32[1,64], index: 4, kind: input, shape index: {}]   ;;  %s921_s5 = inlined_call_operand.vmem [shape: f32[1,64], index: 5, kind: input, shape index: {}]   ;;  %s922_s6 = inlined_call_operand.<no memory space> [shape: f32[1,1], index: 6, kind: input, shape index: {}]   ;;  %s923_s7 = inlined_call_operand.vmem [shape: f32[2,1], index: 7, kind: output, shape index: {}]  }
   0x1   :  { %v692_v0 = vld [vmem:[%s916_s3 + $0x78] sm:$0xff]  ;;  %v691_v4 = vld [vmem:[%s916_s3 + $0x70] sm:$0xff]  ;;  %v690_v8 = vld [vmem:[%s916_s3 + $0x68] sm:$0xff] }
   0x2   :  { %v684_v1 = vld [vmem:[%s916_s3 + $0x38] sm:$0xff]  ;;  %162 = vmatpush.bf16.msra.mxu0 %v692_v0  ;;  %v683_v5 = vld [vmem:[%s916_s3 + $0x30] sm:$0xff]  ;;  %v682_v9 = vld [vmem:[%s916_s3 + $0x28] sm:$0xff] }
   0x3   :  { %v700_v2 = vld [vmem:[%s916_s3 + $0xb8] sm:$0xff]  ;;  %231 = vmatpush.bf16.msra.mxu1 %v684_v1  ;;  %v699_v6 = vld [vmem:[%s916_s3 + $0xb0] sm:$0xff]  ;;  %v698_v10 = vld [vmem:[%s916_s3 + $0xa8] sm:$0xff] }
   0x4   :  { %v708_v3 = vld [vmem:[%s916_s3 + $0xf8] sm:$0xff]  ;;  %338 = vmatpush.bf16.msra.mxu2 %v700_v2  ;;  %v707_v7 = vld [vmem:[%s916_s3 + $0xf0] sm:$0xff]  ;;  %v706_v11 = vld [vmem:[%s916_s3 + $0xe8] sm:$0xff] }
   0x5   :  { %442 = vmatpush.bf16.msra.mxu3 %v708_v3  ;;  %v689_v12 = vld [vmem:[%s916_s3 + $0x60] sm:$0xff]  ;;  %v688_v28 = vld [vmem:[%s916_s3 + $0x58] sm:$0xff]  ;;  %v687_v44 = vld [vmem:[%s916_s3 + $0x50] sm:$0xff] }
   0x6   :  { %163 = vmatpush.bf16.msra.mxu0 %v691_v4  ;;  %v681_v13 = vld [vmem:[%s916_s3 + $0x20] sm:$0xff]  ;;  %v680_v29 = vld [vmem:[%s916_s3 + $0x18] sm:$0xff]  ;;  %v679_v48 = vld [vmem:[%s916_s3 + $0x10] sm:$0xff] }
   0x7   :  { %232 = vmatpush.bf16.msra.mxu1 %v683_v5  ;;  %v697_v14 = vld [vmem:[%s916_s3 + $0xa0] sm:$0xff]  ;;  %v696_v34 = vld [vmem:[%s916_s3 + $0x98] sm:$0xff]  ;;  %v695_v49 = vld [vmem:[%s916_s3 + $0x90] sm:$0xff] }
   0x8   :  { %339 = vmatpush.bf16.msra.mxu2 %v699_v6  ;;  %v705_v15 = vld [vmem:[%s916_s3 + $0xe0] sm:$0xff]  ;;  %v704_v35 = vld [vmem:[%s916_s3 + $0xd8] sm:$0xff]  ;;  %v703_v50 = vld [vmem:[%s916_s3 + $0xd0] sm:$0xff] }
   0x9   :  { %443 = vmatpush.bf16.msra.mxu3 %v707_v7  ;;  %v28_v16 = vld [vmem:[%s917_s0] sm:$0x1]  ;;  %v29_v17 = vld [vmem:[%s917_s0 + $0x2] sm:$0x1]  ;;  %v825_v22 = vld [vmem:[%s917_s0] sm:$0x2] }
   0xa   :  { %164 = vmatpush.bf16.msra.mxu0 %v690_v8  ;;  %v31_v18 = vunpack.c.l.bf16 %v28_v16  ;;  %v815_v19 = vld [vmem:[%s918_s1] ss:$0 sm:$0xff]  ;;  %v32_v20 = vunpack.c.l.bf16 %v29_v17  ;;  %v833_v26 = vld [vmem:[%s917_s0 + $0x2] sm:$0x2]  ;;  %v246_v27 = vunpack.c.l.bf16 %v825_v22  ;;  %v686_v63 = vld [vmem:[%s916_s3 + $0x48] sm:$0xff] }
   0xb   :  { %233 = vmatpush.bf16.msra.mxu1 %v682_v9  ;;  %v820_v21 = vld [vmem:[%s919_s2] ss:$0 sm:$0xff]  ;;  %v72_v23 = vrot.slane %v815_v19, 7  ;;  %v35_v24 = vrot.slane %v815_v19, 1  ;;  %v247_v33 = vunpack.c.l.bf16 %v833_v26  ;;  %v248_v39 = vrot.slane %v815_v19, 6  ;;  %v678_v0 = vld [vmem:[%s916_s3 + $0x8] sm:$0xff] }
   0xc   :  { %340 = vmatpush.bf16.msra.mxu2 %v698_v10  ;;  %v38_v25 = vmul.f32 %v815_v19, %v31_v18  ;;  %v75_v30 = vmul.f32 %v815_v19, %v32_v20  ;;  %v76_v31 = vrot.slane %v820_v21, 7  ;;  %v43_v32 = vrot.slane %v820_v21, 1  ;;  %v694_v4 = vld [vmem:[%s916_s3 + $0x88] sm:$0xff]  ;;  %v685_v17 = vld [vmem:[%s916_s3 + $0x40] sm:$0xff] }
   0xd   :  { %444 = vmatpush.bf16.msra.mxu3 %v706_v11  ;;  %v74_v36 = vmul.f32 %v72_v23, %v31_v18  ;;  %v39_v37 = vmul.f32 %v35_v24, %v32_v20  ;;  %v251_v41 = vmul.f32 %v247_v33, %v72_v23  ;;  %v252_v42 = vrot.slane %v820_v21, 6  ;;  %v702_v5 = vld [vmem:[%s916_s3 + $0xc8] sm:$0xff]  ;;  %v677_v18 = vld [vmem:[%s916_s3] sm:$0xff] }
   0xe   :  { %165 = vmatpush.bf16.msra.mxu0 %v689_v12  ;;  %v46_v38 = vadd.f32 %v820_v21, %v38_v25  ;;  %v79_v40 = vadd.f32 %v820_v21, %v75_v30  ;;  %v352_v43 = vrot.slane %v815_v19, 5  ;;  %v250_v52 = vmul.f32 %v248_v39, %v246_v27  ;;  %v701_v24 = vld [vmem:[%s916_s3 + $0xc0] sm:$0xff] }
   0xf   :  { %234 = vmatpush.bf16.msra.mxu1 %v681_v13  ;;  %v78_v45 = vadd.f32 %v76_v31, %v74_v36  ;;  %v47_v46 = vadd.f32 %v43_v32, %v39_v37  ;;  %v255_v53 = vadd.f32 %v251_v41, %v76_v31  ;;  %v355_v13 = vmul.f32 %v248_v39, %v247_v33 }
  0x10   :  { %341 = vmatpush.bf16.msra.mxu2 %v697_v14  ;;  %vm48_vm0 = vcmp.ge.f32.partialorder %v46_v38, 0.0  ;;  %v50_v47 = vmul.f32 0.2, %v46_v38  ;;  %vm81_vm1 = vcmp.ge.f32.partialorder %v79_v40, 0.0  ;;  %v83_v51 = vmul.f32 0.2, %v79_v40 }
  0x11   :  { %445 = vmatpush.bf16.msra.mxu3 %v705_v15  ;;  %vm80_vm2 = vcmp.ge.f32.partialorder %v78_v45, 0.0  ;;  %v82_v54 = vmul.f32 0.2, %v78_v45  ;;  %vm49_vm3 = vcmp.ge.f32.partialorder %v47_v46, 0.0  ;;  %v51_v55 = vmul.f32 0.2, %v47_v46 }
  0x12   :  { %166 = vmatpush.bf16.msra.mxu0 %v688_v28  ;;  %v85_v56 = vsel %vm81_vm1, %v79_v40, %v83_v51  ;;  %v52_v57 = vsel %vm48_vm0, %v46_v38, %v50_v47  ;;  %v254_v58 = vadd.f32 %v252_v42, %v250_v52  ;;  %vm257_vm4 = vcmp.ge.f32.partialorder %v255_v53, 0.0 }
  0x13   :  { %235 = vmatpush.bf16.msra.mxu1 %v680_v29  ;;  %v84_v59 = vsel %vm80_vm2, %v78_v45, %v82_v54  ;;  %v87_v60 = vpack.c.bf16 %v85_v56, %v85_v56  ;;  %v53_v61 = vsel %vm49_vm3, %v47_v46, %v51_v55  ;;  %v54_v62 = vpack.c.bf16 %v52_v57, %v52_v57  ;;  %v711_v56 = vld [vmem:[%s920_s4] ss:$0 sm:$0xff] }
  0x14   :  { %342 = vmatpush.bf16.msra.mxu2 %v696_v34  ;;  %v86_v1 = vpack.c.bf16 %v84_v59, %v84_v59  ;;  %v55_v2 = vpack.c.bf16 %v53_v61, %v53_v61  ;;  %vm256_vm5 = vcmp.ge.f32.partialorder %v254_v58, 0.0  ;;  %v258_v3 = vmul.f32 0.2, %v254_v58 }
  0x15   :  { %446 = vmatpush.bf16.msra.mxu3 %v704_v35  ;;  %v108_v6 = vunpack.c.l.b16 %v87_v60  ;;  %v177_v7 = vunpack.c.l.b16 %v54_v62  ;;  %v259_v8 = vmul.f32 0.2, %v255_v53  ;;  %v354_v9 = vmul.f32 %v352_v43, %v246_v27  ;;  %v712_v60 = vld [vmem:[%s921_s5] ss:$0 sm:$0xff] }
  0x16   :  { %167 = vmatpush.bf16.msra.mxu0 %v687_v44  ;;  %v107_v10 = vunpack.c.l.b16 %v86_v1  ;;  %v178_v11 = vunpack.c.l.b16 %v55_v2  ;;  %v260_v12 = vsel %vm256_vm5, %v254_v58, %v258_v3  ;;  %v356_v16 = vrot.slane %v820_v21, 5  ;;  %v693_v21 = vld [vmem:[%s916_s3 + $0x80] sm:$0xff] }
  0x17   :  { %236 = vmatpush.bf16.msra.mxu1 %v679_v48  ;;  %v261_v14 = vsel %vm257_vm4, %v255_v53, %v259_v8  ;;  %v262_v15 = vpack.c.bf16 %v260_v12, %v260_v12  ;;  %v359_v23 = vadd.f32 %v355_v13, %v252_v42  ;;  %v12_v48 = vstv %s922_s6 }
  0x18   :  { %343 = vmatpush.bf16.msra.mxu2 %v695_v49  ;;  %v109_v19 = vrot.slane %v107_v10, 1  ;;  %v179_v20 = vrot.slane %v178_v11, 7  ;;  %v263_v22 = vpack.c.bf16 %v261_v14, %v261_v14  ;;  %v358_v26 = vadd.f32 %v356_v16, %v354_v9  ;;  %13 = vst [vmem:[#allocation2] sm:$0x1] %v12_v48 }
  0x19   :  { %447 = vmatpush.bf16.msra.mxu3 %v703_v50  ;;  %v283_v25 = vunpack.c.l.b16 %v262_v15  ;;  %vm361_vm7 = vcmp.ge.f32.partialorder %v359_v23, 0.0  ;;  %v363_v35 = vmul.f32 0.2, %v359_v23 }
  0x1a   :  { %168 = vmatpush.bf16.msra.mxu0 %v686_v63  ;;  %v111_v27 = vsel %vm110_vm6, %v108_v6, %v109_v19  ;;  %v180_v28 = vsel %vm110_vm6, %v179_v20, %v177_v7  ;;  %v284_v29 = vunpack.c.l.b16 %v263_v22  ;;  %vm360_vm8 = vcmp.ge.f32.partialorder %v358_v26, 0.0 }
  0x1b   :  { %237 = vmatpush.bf16.msra.mxu1 %v678_v0  ;;  %v112_v30 = vpack.c.b16 %v111_v27, %v111_v27  ;;  %v181_v31 = vpack.c.b16 %v180_v28, %v180_v28  ;;  %v285_v32 = vrot.slane %v283_v25, 2  ;;  %v362_v34 = vmul.f32 0.2, %v358_v26 }
  0x1c   :  { %344 = vmatpush.bf16.msra.mxu2 %v694_v4  ;;  %v286_v33 = vrot.slane %v284_v29, 1  ;;  %v365_v38 = vsel %vm361_vm7, %v359_v23, %v363_v35 }
  0x1d   :  { %448 = vmatpush.bf16.msra.mxu3 %v702_v5  ;;  %v364_v37 = vsel %vm360_vm8, %v358_v26, %v362_v34  ;;  %v367_v41 = vpack.c.bf16 %v365_v38, %v365_v38 }
  0x1e   :  { %169 = vmatpush.bf16.msra.mxu0 %v685_v17  ;;  %v287_v36 = vsel %vm110_vm6, %v286_v33, %v285_v32  ;;  %v366_v40 = vpack.c.bf16 %v364_v37, %v364_v37 }
  0x1f   :  { %238 = vmatpush.bf16.msra.mxu1 %v677_v18  ;;  %v288_v39 = vpack.c.b16 %v287_v36, %v287_v36  ;;  %v388_v43 = vunpack.c.l.b16 %v367_v41  ;;  %v713_v1 = vld [vmem:[#allocation2] ss:$0 sm:$0xff] }
  0x20   :  { %345 = vmatpush.bf16.msra.mxu2 %v693_v21  ;;  %v387_v42 = vunpack.c.l.b16 %v366_v40 }
  0x21   :  { %449 = vmatpush.bf16.msra.mxu3 %v701_v24  ;;  %170 = vmatmul.bf16.vlgmr.msra.gmra.mxu0 %v112_v30  ;;  %v390_v45 = vrot.slane %v388_v43, 2 }
  0x22   :  { %239 = vmatmul.bf16.vlgmr.msra.gmra.mxu1 %v181_v31  ;;  %v389_v44 = vrot.slane %v387_v42, 3 }
  0x23   :  { %346 = vmatmul.bf16.vlgmr.msra.gmra.mxu2 %v288_v39 }
  0x24   :  { %v391_v46 = vsel %vm110_vm6, %v390_v45, %v389_v44 }
  0x25   :  { %v392_v47 = vpack.c.b16 %v391_v46, %v391_v46 }
  0x27   :  { %450 = vmatmul.bf16.vlgmr.msra.gmra.mxu3 %v392_v47 }
  0x9e   :  { %v171_v49 = vpop.f32.mrf.mxu0 }
  0x9f   :  { %v240_v50 = vpop.f32.mrf.mxu1 }
  0xa0   :  { %v241_v51 = vadd.f32 %v240_v50, %v171_v49 }
  0xa6   :  { %v347_v52 = vpop.f32.mrf.mxu2  ;;  %v173_v53 = vpop.f32.mrf.mxu0 }
  0xa7   :  { %v242_v54 = vpop.f32.mrf.mxu1  ;;  %v351_v55 = vadd.f32 %v347_v52, %v241_v51 }
  0xaa   :  { %v451_v57 = vpop.f32.mrf.mxu3 }
  0xab   :  { %v455_v58 = vadd.f32 %v451_v57, %v351_v55 }
  0xad   :  { %v460_v61 = vadd.f32 %v711_v56, %v455_v58 }
  0xae   :  { %v349_v59 = vpop.f32.mrf.mxu2 }
  0xaf   :  { %v465_v62 = vmul.f32 %v712_v60, %v460_v61 }
  0xb1   :  { %v467_v63 = vsel %vm466_vm9, %v465_v62, 0.0 }
  0xb2   :  { %v453_v0 = vpop.f32.mrf.mxu3  ;;  %468 = vadd.xlane.f32.xlu0 %v467_v63 }
 0x125   :  { %v469_v2 = vpop.xlane.xlu0 %468 }
 0x126   :  { %v474_v3 = vadd.f32 %v713_v1, %v469_v2 }
 0x128   :  { %v676_v4 = vmul.f32 -1.442695, %v474_v3 }
 0x12a   :  { %714 = vpow2.f32 %v676_v4 }
 0x130   :  { %v715_v5 = vpop.eup %714 }
 0x131   :  { %v478_v6 = vadd.f32 1.0, %v715_v5 }
 0x133   :  { %716 = vrcp.f32 %v478_v6  ;;  %v490_v10 = vand.u32 2147483648, %v478_v6  ;;  %v488_v12 = vand.u32 2147483647, %v478_v6  ;;  %vm484_vm11 = vweird.f32 %v478_v6 }
 0x135   :  { %v491_v14 = vor.u32 1.1754944e-38, %v490_v10  ;;  %vm489_vm14 = vcmp.eq.f32.partialorder %v488_v12, 8.507059e+37 }
 0x139   :  { %v717_v7 = vpop.eup %716 }
 0x13a   :  { %v480_v8 = vmul.f32 %v717_v7, %v478_v6  ;;  %vm485_vm10 = vweird.f32 %v717_v7 }
 0x13b   :  { %vm486_vm12 = vmor %vm484_vm11, %vm485_vm10 }
 0x13c   :  { %v481_v9 = vsub.f32 1.0, %v480_v8 }
 0x13e   :  { %v482_v11 = vmul.f32 %v717_v7, %v481_v9 }
 0x140   :  { %v483_v13 = vadd.f32 %v717_v7, %v482_v11 }
 0x142   :  { %v487_v15 = vsel %vm486_vm12, %v717_v7, %v483_v13 }
 0x143   :  { %v492_v16 = vsel %vm489_vm14, %v491_v14, %v487_v15 }
 0x144   :  { %495 = vst.msk [vmem:[%s923_s7] sm:$0x3] %vm494_vm13, %v492_v16 }

</bundles_post_ra>
